<compile_context>
chip_gen: v6e
topology: v6e:2x2x1
jax: 0.10.0
libtpu: 0.0.40
codegen_flags: <defaults>
</compile_context>

<pallas_src>
import jax
import jax.numpy as jnp
from jax.experimental import pallas as pl
from jax.experimental.pallas import tpu as pltpu

_LANE = 128
_XPOSE_SUBTILE = 128                    # transpose w3 in 128x128 sub-tiles
_VMEM_TILE_BUDGET = 20 * 1024 * 1024    # budget for double-buffered per-step footprint


def _weight_transform_kernel(w0_ref, w1_ref, w2_ref, w3_ref, out_ref):
    # Plain copies for the three untransposed weights.
    out_ref[0, :, :] = w0_ref[...]
    out_ref[1, :, :] = w1_ref[...]
    out_ref[2, :, :] = w2_ref[...]
    # The w3 tile was fetched from the mirrored block (j, i); transposing the tile data
    # completes the global transpose. Done in 128x128 sub-tiles so the transient vreg
    # footprint stays small (XLU work hides under the HBM-bound copy, no spills on v7x).
    t = w3_ref.shape[0]
    s = min(t, _XPOSE_SUBTILE)
    for r in range(0, t, s):
        for c in range(0, t, s):
            out_ref[3, r:r + s, c:c + s] = jnp.transpose(
                w3_ref[c:c + s, r:r + s], (1, 0))


def _round_up(x: int, m: int) -> int:
    return ((x + m - 1) // m) * m


def _pick_tile(h_pad: int, itemsize: int) -> int:
    """Largest multiple-of-128 tile that (a) divides h_pad, (b) keeps the double-buffered
    VMEM footprint under budget, and (c) leaves >= 2 grid steps per axis when h_pad >= 256
    (pipelining + megacore split on v7x)."""
    # Per-step footprint (x2 buffers): 4 input tiles + (4,T,T) output = 16*T*T*itemsize.
    t_budget = int((_VMEM_TILE_BUDGET // (16 * itemsize)) ** 0.5)
    t_budget = max(_LANE, (t_budget // _LANE) * _LANE)
    if h_pad >= 2 * _LANE:
        t_cap = max(_LANE, ((h_pad // 2) // _LANE) * _LANE)
    else:
        t_cap = h_pad
    t_max = min(t_budget, t_cap, h_pad)
    for t in range(t_max, _LANE - 1, -_LANE):
        if h_pad % t == 0:
            return t
    return _LANE


def weight_transform_3d(state_dict, y):
    """JAX/Pallas equivalent of WeightTransform3D.forward."""
    w0 = state_dict["layers.0.weight"]
    w1 = state_dict["layers.1.weight"]
    w2 = state_dict["layers.2.weight"]
    w3 = state_dict["layers.3.weight"]
    H, H2 = w0.shape
    assert H == H2 and w1.shape == (H, H) and w2.shape == (H, H) and w3.shape == (H, H), \
        "stacking requires square, equal shapes"
    assert w0.dtype == w1.dtype == w2.dtype == w3.dtype, "all weights must share a dtype"
    dtype = w0.dtype
    itemsize = jnp.dtype(dtype).itemsize

    # Tiny matrices: a Pallas custom call is pure overhead for a ~KiB copy; let XLA do it.
    if H < _LANE:
        return jnp.stack([w0, w1, w2, w3.T], axis=0), y

    # Pad to a multiple of 128 so every block is lane/sublane aligned; slice back below.
    H_pad = _round_up(H, _LANE)
    if H_pad != H:
        pad = ((0, H_pad - H), (0, H_pad - H))
        w0p, w1p, w2p, w3p = (jnp.pad(w, pad) for w in (w0, w1, w2, w3))
    else:
        w0p, w1p, w2p, w3p = w0, w1, w2, w3

    T = _pick_tile(H_pad, itemsize)
    grid = (H_pad // T, H_pad // T)
    vmem_need = 16 * T * T * itemsize            # double-buffered input + output tiles
    vmem_limit = int(vmem_need) + (8 << 20)      # headroom for Mosaic internal scratch

    out = pl.pallas_call(
        _weight_transform_kernel,
        out_shape=jax.ShapeDtypeStruct((4, H_pad, H_pad), dtype),
        grid_spec=pltpu.PrefetchScalarGridSpec(
            num_scalar_prefetch=0,
            grid=grid,
            in_specs=[
                pl.BlockSpec((T, T), lambda i, j: (i, j)),   # W0 tile
                pl.BlockSpec((T, T), lambda i, j: (i, j)),   # W1 tile
                pl.BlockSpec((T, T), lambda i, j: (i, j)),   # W2 tile
                pl.BlockSpec((T, T), lambda i, j: (j, i)),   # W3: fetch the mirrored tile
            ],
            out_specs=pl.BlockSpec((4, T, T), lambda i, j: (0, i, j)),
        ),
        compiler_params=pltpu.CompilerParams(
            # Pure copy, no reduction axis: both grid axes independent -> megacore split.
            dimension_semantics=("parallel", "parallel"),
            vmem_limit_bytes=vmem_limit,
        ),
        cost_estimate=pl.CostEstimate(
            flops=0, transcendentals=0,
            bytes_accessed=8 * H_pad * H_pad * itemsize),
    )(w0p, w1p, w2p, w3p)

    if H_pad != H:
        out = out[:, :H, :H]
    return out, y

    # TODO(synk): WeightTransform3D.backproject references an undefined self.vq in the
    # original module; no Pallas equivalent is implemented.


if __name__ == "__main__":
    key = jax.random.PRNGKey(0)

    def make_state_dict(key, h, dtype=jnp.float32):
        k0, k1, k2, k3 = jax.random.split(key, 4)
        return {
            "layers.0.weight": jax.random.normal(k0, (h, h), dtype=dtype),
            "layers.1.weight": jax.random.normal(k1, (h, h), dtype=dtype),
            "layers.2.weight": jax.random.normal(k2, (h, h), dtype=dtype),
            "layers.3.weight": jax.random.normal(k3, (h, h), dtype=dtype),
        }

    def reference(sd):
        return jnp.stack(
            [
                sd["layers.0.weight"],
                sd["layers.1.weight"],
                sd["layers.2.weight"],
                sd["layers.3.weight"].T,
            ],
            axis=0,
        )

    k_big, k_pad, k_small, ky = jax.random.split(key, 4)
    y = jax.random.normal(ky, (8, 3), dtype=jnp.float32)  # auxiliary label passthrough

    # Main Pallas path: H=512 f32 -> T=256, grid (2,2); exercises the mirrored
    # off-diagonal w3 tiles, pipelining, and the megacore split.
    H = 512
    sd_big = make_state_dict(k_big, H)
    weights, y_out = weight_transform_3d(sd_big, y)
    jax.block_until_ready((weights, y_out))
    assert weights.shape == (4, H, H)
    assert jnp.array_equal(weights, reference(sd_big))
    assert jnp.array_equal(y_out, y)

    # Non-multiple-of-128 H: padded to 256, T=128, grid (2,2), then sliced back.
    Hp = 200
    sd_pad = make_state_dict(k_pad, Hp)
    w_pad, y_pad = weight_transform_3d(sd_pad, y)
    jax.block_until_ready((w_pad, y_pad))
    assert w_pad.shape == (4, Hp, Hp)
    assert jnp.array_equal(w_pad, reference(sd_pad))
    assert jnp.array_equal(y_pad, y)

    # Tiny-H fallback path (skip Pallas for ~KiB copies).
    sd_small = make_state_dict(k_small, 32)
    w_small, y_small = weight_transform_3d(sd_small, y)
    jax.block_until_ready((w_small, y_small))
    assert w_small.shape == (4, 32, 32)
    assert jnp.array_equal(w_small, reference(sd_small))
    assert jnp.array_equal(y_small, y)

    print("KERNEL_OK")
</pallas_src>

<mosaic_0001>
module attributes {stable_mosaic.version = 11 : i64} {
  func.func @_weight_transform_kernel(%arg0: i32, %arg1: i32, %arg2: memref<256x256xf32, #tpu.memory_space<vmem>>, %arg3: memref<256x256xf32, #tpu.memory_space<vmem>>, %arg4: memref<256x256xf32, #tpu.memory_space<vmem>>, %arg5: memref<256x256xf32, #tpu.memory_space<vmem>>, %arg6: memref<4x256x256xf32, #tpu.memory_space<vmem>>) attributes {dimension_semantics = [#tpu.dimension_semantics<parallel>, #tpu.dimension_semantics<parallel>], iteration_bounds = array<i64: 2, 2>, scalar_prefetch = 0 : i64, scratch_operands = 0 : i64, tpu.core_type = #tpu.core_type<tc>, window_params = [{transform_indices = @transform_0, window_bounds = array<i64: 256, 256>}, {transform_indices = @transform_1, window_bounds = array<i64: 256, 256>}, {transform_indices = @transform_2, window_bounds = array<i64: 256, 256>}, {transform_indices = @transform_3, window_bounds = array<i64: 256, 256>}, {transform_indices = @transform_4, window_bounds = array<i64: 4, 256, 256>}]} {
    %c0 = arith.constant 0 : index
    %c0_0 = arith.constant 0 : index
    %0 = vector.load %arg2[%c0, %c0_0] : memref<256x256xf32, #tpu.memory_space<vmem>>, vector<256x256xf32>
    %c0_1 = arith.constant 0 : index
    %c0_2 = arith.constant 0 : index
    %c0_3 = arith.constant 0 : index
    %1 = vector.load %arg6[%c0_1, %c0_2, %c0_3] : memref<4x256x256xf32, #tpu.memory_space<vmem>>, vector<1x256x256xf32>
    %2 = vector.shape_cast %1 : vector<1x256x256xf32> to vector<256x256xf32>
    %3 = vector.shape_cast %0 : vector<256x256xf32> to vector<1x256x256xf32>
    tpu.vector_store %arg6[%c0_1, %c0_2, %c0_3], %3 {strides = array<i32>} : memref<4x256x256xf32, #tpu.memory_space<vmem>>, vector<1x256x256xf32>,
    %c0_4 = arith.constant 0 : index
    %c0_5 = arith.constant 0 : index
    %4 = vector.load %arg3[%c0_4, %c0_5] : memref<256x256xf32, #tpu.memory_space<vmem>>, vector<256x256xf32>
    %c1 = arith.constant 1 : index
    %c0_6 = arith.constant 0 : index
    %c0_7 = arith.constant 0 : index
    %5 = vector.load %arg6[%c1, %c0_6, %c0_7] : memref<4x256x256xf32, #tpu.memory_space<vmem>>, vector<1x256x256xf32>
    %6 = vector.shape_cast %5 : vector<1x256x256xf32> to vector<256x256xf32>
    %7 = vector.shape_cast %4 : vector<256x256xf32> to vector<1x256x256xf32>
    tpu.vector_store %arg6[%c1, %c0_6, %c0_7], %7 {strides = array<i32>} : memref<4x256x256xf32, #tpu.memory_space<vmem>>, vector<1x256x256xf32>,
    %c0_8 = arith.constant 0 : index
    %c0_9 = arith.constant 0 : index
    %8 = vector.load %arg4[%c0_8, %c0_9] : memref<256x256xf32, #tpu.memory_space<vmem>>, vector<256x256xf32>
    %c2 = arith.constant 2 : index
    %c0_10 = arith.constant 0 : index
    %c0_11 = arith.constant 0 : index
    %9 = vector.load %arg6[%c2, %c0_10, %c0_11] : memref<4x256x256xf32, #tpu.memory_space<vmem>>, vector<1x256x256xf32>
    %10 = vector.shape_cast %9 : vector<1x256x256xf32> to vector<256x256xf32>
    %11 = vector.shape_cast %8 : vector<256x256xf32> to vector<1x256x256xf32>
    tpu.vector_store %arg6[%c2, %c0_10, %c0_11], %11 {strides = array<i32>} : memref<4x256x256xf32, #tpu.memory_space<vmem>>, vector<1x256x256xf32>,
    %c0_12 = arith.constant 0 : index
    %c0_13 = arith.constant 0 : index
    %12 = vector.load %arg5[%c0_12, %c0_13] : memref<256x256xf32, #tpu.memory_space<vmem>>, vector<128x128xf32>
    %13 = tpu.transpose %12, [1, 0] : vector<128x128xf32> -> vector<128x128xf32>
    %c3 = arith.constant 3 : index
    %c0_14 = arith.constant 0 : index
    %c0_15 = arith.constant 0 : index
    %14 = vector.load %arg6[%c3, %c0_14, %c0_15] : memref<4x256x256xf32, #tpu.memory_space<vmem>>, vector<1x128x128xf32>
    %15 = vector.shape_cast %14 : vector<1x128x128xf32> to vector<128x128xf32>
    %16 = vector.shape_cast %13 : vector<128x128xf32> to vector<1x128x128xf32>
    tpu.vector_store %arg6[%c3, %c0_14, %c0_15], %16 {strides = array<i32>} : memref<4x256x256xf32, #tpu.memory_space<vmem>>, vector<1x128x128xf32>,
    %c128 = arith.constant 128 : index
    %c0_16 = arith.constant 0 : index
    %17 = vector.load %arg5[%c128, %c0_16] : memref<256x256xf32, #tpu.memory_space<vmem>>, vector<128x128xf32>
    %18 = tpu.transpose %17, [1, 0] : vector<128x128xf32> -> vector<128x128xf32>
    %c3_17 = arith.constant 3 : index
    %c0_18 = arith.constant 0 : index
    %c128_19 = arith.constant 128 : index
    %19 = vector.load %arg6[%c3_17, %c0_18, %c128_19] : memref<4x256x256xf32, #tpu.memory_space<vmem>>, vector<1x128x128xf32>
    %20 = vector.shape_cast %19 : vector<1x128x128xf32> to vector<128x128xf32>
    %21 = vector.shape_cast %18 : vector<128x128xf32> to vector<1x128x128xf32>
    tpu.vector_store %arg6[%c3_17, %c0_18, %c128_19], %21 {strides = array<i32>} : memref<4x256x256xf32, #tpu.memory_space<vmem>>, vector<1x128x128xf32>,
    %c0_20 = arith.constant 0 : index
    %c128_21 = arith.constant 128 : index
    %22 = vector.load %arg5[%c0_20, %c128_21] : memref<256x256xf32, #tpu.memory_space<vmem>>, vector<128x128xf32>
    %23 = tpu.transpose %22, [1, 0] : vector<128x128xf32> -> vector<128x128xf32>
    %c3_22 = arith.constant 3 : index
    %c128_23 = arith.constant 128 : index
    %c0_24 = arith.constant 0 : index
    %24 = vector.load %arg6[%c3_22, %c128_23, %c0_24] : memref<4x256x256xf32, #tpu.memory_space<vmem>>, vector<1x128x128xf32>
    %25 = vector.shape_cast %24 : vector<1x128x128xf32> to vector<128x128xf32>
    %26 = vector.shape_cast %23 : vector<128x128xf32> to vector<1x128x128xf32>
    tpu.vector_store %arg6[%c3_22, %c128_23, %c0_24], %26 {strides = array<i32>} : memref<4x256x256xf32, #tpu.memory_space<vmem>>, vector<1x128x128xf32>,
    %c128_25 = arith.constant 128 : index
    %c128_26 = arith.constant 128 : index
    %27 = vector.load %arg5[%c128_25, %c128_26] : memref<256x256xf32, #tpu.memory_space<vmem>>, vector<128x128xf32>
    %28 = tpu.transpose %27, [1, 0] : vector<128x128xf32> -> vector<128x128xf32>
    %c3_27 = arith.constant 3 : index
    %c128_28 = arith.constant 128 : index
    %c128_29 = arith.constant 128 : index
    %29 = vector.load %arg6[%c3_27, %c128_28, %c128_29] : memref<4x256x256xf32, #tpu.memory_space<vmem>>, vector<1x128x128xf32>
    %30 = vector.shape_cast %29 : vector<1x128x128xf32> to vector<128x128xf32>
    %31 = vector.shape_cast %28 : vector<128x128xf32> to vector<1x128x128xf32>
    tpu.vector_store %arg6[%c3_27, %c128_28, %c128_29], %31 {strides = array<i32>} : memref<4x256x256xf32, #tpu.memory_space<vmem>>, vector<1x128x128xf32>,
    return
  }
  func.func @transform_0(%arg0: i32, %arg1: i32) -> (i32, i32) {
    %c0_i32 = arith.constant 0 : i32
    return %arg0, %arg1 : i32, i32
  }
  func.func @transform_1(%arg0: i32, %arg1: i32) -> (i32, i32) {
    %c0_i32 = arith.constant 0 : i32
    return %arg0, %arg1 : i32, i32
  }
  func.func @transform_2(%arg0: i32, %arg1: i32) -> (i32, i32) {
    %c0_i32 = arith.constant 0 : i32
    return %arg0, %arg1 : i32, i32
  }
  func.func @transform_3(%arg0: i32, %arg1: i32) -> (i32, i32) {
    %c0_i32 = arith.constant 0 : i32
    return %arg1, %arg0 : i32, i32
  }
  func.func @transform_4(%arg0: i32, %arg1: i32) -> (i32, i32, i32) {
    %c0_i32 = arith.constant 0 : i32
    %c0_i32_0 = arith.constant 0 : i32
    return %c0_i32, %arg0, %arg1 : i32, i32, i32
  }
}

</mosaic_0001>

<bundles_post_ra>
// kernel: tpu_custom_call.1
= control target key start
LH: loop header
LB: loop body
LE: loop exit
PB: predicated region body
PF: predicated region fallthrough
CT: control target
= control target key end

     0   :  { %s2570_s0 = inlined_call_operand.hbm [shape: f32[512,512], index: 0, kind: input, shape index: {}]   ;;  %s2571_s1 = inlined_call_operand.hbm [shape: f32[512,512], index: 1, kind: input, shape index: {}]   ;;  %s2572_s2 = inlined_call_operand.hbm [shape: f32[512,512], index: 2, kind: input, shape index: {}]   ;;  %s2573_s3 = inlined_call_operand.hbm [shape: f32[512,512], index: 3, kind: input, shape index: {}]   ;;  %s2574_s4 = inlined_call_operand.hbm [shape: f32[4,512,512], index: 4, kind: output, shape index: {}]  }
   0x1   :  { %2584 = sst [smem:[#allocation25_spill]] %s2570_s0 }
   0x2   :  { %2585 = sst [smem:[#allocation26_spill]] %s2571_s1 }
   0x3   :  { %2586 = sst [smem:[#allocation27_spill]] %s2574_s4 }
   0x4   :  { %9 = vsyncpa [#allocation3], 0 }
   0x5   :  { %11 = vsyncpa [#allocation3 + $0x1], 0 }
   0x6   :  { %12 = vsyncpa [#allocation6], 0 }
   0x7   :  { %14 = vsyncpa [#allocation6 + $0x1], 0 }
   0x8   :  { %15 = vsyncpa [#allocation9], 0 }
   0x9   :  { %17 = vsyncpa [#allocation9 + $0x1], 0 }
   0xa   :  { %18 = vsyncpa [#allocation4], 0 }
   0xb   :  { %20 = vsyncpa [#allocation4 + $0x1], 0  ;;  %s1801_s15 = smov 0   ;;  %s1803_s16 = smov 0  }
   0xc   :  { %s1805_s17 = smov 0   ;;  %s1807_s18 = smov 0  }
   0xd   :  { %s1809_s19 = smov 0   ;;  %s1811_s20 = smov 0  }
   0xe   :  { %s1813_s21 = smov 0   ;;  %s1815_s22 = smov 0  }
   0xf LB: > { %2587 = sst [smem:[#allocation17_spill]] %s1731_s15  ;;  %s1842_s23 = sadd.s32 4294967295, %s1759_s22   ;;  %s1759_s22 = sphi %s1815_s22, %s26_s22   ;;  %s1755_s21 = sphi %s1813_s21, %s2618_s21   ;;  %s1751_s20 = sphi %s1811_s20, %s2617_s20   ;;  %s1747_s19 = sphi %s1809_s19, %s2616_s19   ;;  %s1743_s18 = sphi %s1807_s18, %s2615_s18   ;;  %s1739_s17 = sphi %s1805_s17, %s2610_s17   ;;  %s1735_s16 = sphi %s1803_s16, %s2614_s16   ;;  %s1731_s15 = sphi %s1801_s15, %s2613_s15  }
  0x10   : > { %2588 = sst [smem:[#allocation18_spill]] %s1739_s17  ;;  %s1226_s24 = sadd.s32 4294967294, %s1759_s22  }
  0x11   : > { %2589 = sst [smem:[#allocation19_spill]] %s1747_s19  ;;  %s35_s25 = sadd.s32 1, %s1751_s20 }
  0x12   : > { %s38_s26 = sadd.s32 1, %s1755_s21  ;;  %p36_p0 = scmp.ge.s32.totalorder %s35_s25, 2 }
  0x13   : > { %s47_s27 = sadd.s32 1, %s1739_s17  ;;  %p54_p1 = scmp.ne.s32.totalorder %s1739_s17, %s1735_s16 }
  0x14   : > { %p55_p2 = scmp.eq.s32.totalorder %s1759_s22, 0  ;;  %s2620_s25 = smov (%p36_p0, %s35_s25), 0 }
  0x15   : > { %2590 = sst [smem:[#allocation20_spill]] %s2620_s25  ;;  %s2622_s26 = smov (!%p36_p0, %s38_s26), %s1755_s21 }
  0x16   : > { %s43_s28 = ssub.s32 %s1751_s20, %s2620_s25  ;;  %p1856_p3 = por %p55_p2, %p54_p1 }
  0x17   : > { %p40_p4 = scmp.ge.s32.totalorder %s2622_s26, 2  ;;  %p60_p5 = scmp.ne.s32.totalorder %s1735_s16, %s1731_s15 }
  0x18   : > { %p61_p6 = scmp.eq.s32.totalorder %s1842_s23, 0  ;;  %p170_p7 = scmp.eq.s32.totalorder %s1842_s23, 3 }
  0x19   : > { %s2624_s26 = smov (%p40_p4, %s2622_s26), 0  ;;  %p176_p10 = scmp.eq.s32.totalorder %s1226_s24, 3 }
  0x1a   : > { %2592 = sst [smem:[#allocation21_spill]] %s2624_s26  ;;  %p1866_p8 = por %p61_p6, %p60_p5 }
  0x1b   : > { %p1870_p9 = por %p170_p7, %p54_p1  ;;  %s42_s6 = ssub.s32 %s1755_s21, %s2624_s26 }
  0x1c   : > { %s44_s7 = sor.u32 %s43_s28, %s42_s6  ;;  %p1876_p12 = por %p176_p10, %p60_p5 }
  0x1d   : > { %s2594_s5 = scalar_select %p1870_p9, 1, 0 }
  0x1e   : > { %p45_p11 = scmp.eq.s32.totalorder %s44_s7, 0  ;;  %p1492_p13 = scmp.lt.s32.totalorder %s1759_s22, 4 }
  0x1f   : > { %2595 = sst [smem:[#allocation22_spill]] %s2594_s5  ;;  %s1882_s9 = sand.u32 1, %s1739_s17  }
  0x20   : > { %s2596_s8 = scalar_select %p1876_p12, 1, 0 }
  0x21   : > { %s1885_s10 = scalar_select %p45_p11, %s1739_s17, %s47_s27  }
  0x22   : > { %2597 = sst [smem:[#allocation23_spill]] %s2596_s8  ;;  %s1888_s11 = sshll.u32 %s1882_s9, 9 }
  0x23   : > { %2598 = sst [smem:[#allocation24_spill]] %s1885_s10  ;;  %s1231_s12 = sshll.u32 %s1751_s20, 1 }
  0x24   : > { %s1454_s13 = sshll.u32 %s1755_s21, 7  ;;  %p1894_p0 = pnand %p1492_p13, %p1856_p3 }
  0x25   : > { %s207_s24 = sadd.s32 %s1454_s13, %s1231_s12  ;;  %s220_s6 = sand.u32 1, %s1759_s22  }
  0x26   : > { %s1898_s28 = sshll.u32 %s207_s24, 7  ;;  %s2600_s1 = sld [smem:[#allocation26_spill]] }
  0x27   : > { %s224_s25 = scalar_lea.vmem [#allocation5], %s1888_s11  ;;  %p1249_p1 = scmp.ge.s32.totalorder %s1759_s22, 1 }
  0x28   : > { %s234_s10 = sshll.u32 %s224_s25, 4  ;;  %p290_p2 = scmp.lt.s32.totalorder %s1759_s22, 5  ;;  %s235_s10 = int_to_ptr.vmem [resolvable:$true] %s234_s10 }
  0x29   : > { %s1908_s29 = scalar_lea.sflag [#allocation6], %s220_s6  ;;  %p1571_p3 = pneg %p1894_p0 }
  0x2a   : > { %s1582_s17 = scalar_lea.vmem %s235_s10, 8192  ;;  %s1761_s12 = smov [#allocation5]  }
  0x2b   : > { %p1583_p4 = scmp.ne.s32.totalorder %s235_s10, %s1582_s17  ;;  %s1587_s13 = sshll.u32 %s1761_s12, 4  ;;  %s1588_s13 = int_to_ptr.vmem [resolvable:$false] %s1587_s13 }
  0x2c   : > { %s233_s26 = scalar_lea.hbm %s2600_s1, %s1898_s28  ;;  %s1589_s24 = scalar_lea.vmem %s1588_s13, 16384 }
  0x2d   : > { %p1585_p5 = pnand %p1583_p4, %p1571_p3  ;;  %p1590_p7 = scmp.lt.s32.totalorder %s235_s10, %s1588_s13 }
  0x2e   : > { %p1591_p10 = scmp.lt.s32.totalorder %s1589_s24, %s1582_s17 }
  0x2f   : > { %p1586_p6 = pneg %p1585_p5 }
  0x30   : > { %p1592_p11 = por %p1591_p10, %p1590_p7 }
  0x32   : > { %p1593_p13 = pnand %p1592_p11, %p1586_p6 }
  0x34   : > { %1596 = shalt.err (!%p1593_p13)
}
  0x35   : > { %s2582_s25 = smov 512   ;;  %s1763_s6 = smov 256  }
  0x36   : > { %s1764_s7 = smov 16   ;;  %p1925_p4 = pnand %p1249_p1, %p290_p2 }
  0x37   : > { %1481 = dma.hbm_to_vmem [thread:$0]  (!%p1894_p0), %s233_s26, 8192, %s235_s10, %s1908_s29, %s2582_s25, %s1763_s6, %s1764_s7  }
  0x38   : > { %s2602_s0 = sld [smem:[#allocation25_spill]]  ;;  %s200_s24 = scalar_lea.vmem [#allocation2], %s1888_s11 }
  0x39   : > { %s210_s1 = sshll.u32 %s200_s24, 4  ;;  %s257_s4 = scalar_lea.hbm %s2572_s2, %s1898_s28  ;;  %s211_s1 = int_to_ptr.vmem [resolvable:$true] %s210_s1 }
  0x3a   : > { %s197_s5 = scalar_lea.sflag [#allocation3], %s1882_s9  ;;  %s1610_s19 = scalar_lea.vmem %s211_s1, 8192 }
  0x3b   : > { %p1611_p5 = scmp.ne.s32.totalorder %s211_s1, %s1610_s19  ;;  %s1765_s26 = smov [#allocation2]  }
  0x3c   : > { %s1615_s10 = sshll.u32 %s1765_s26, 4  ;;  %s1616_s10 = int_to_ptr.vmem [resolvable:$false] %s1615_s10 }
  0x3d   : > { %p1613_p1 = pnand %p1611_p5, %p1571_p3  ;;  %s1617_s25 = scalar_lea.vmem %s1616_s10, 16384 }
  0x3e   : > { %s209_s13 = scalar_lea.hbm %s2602_s0, %s1898_s28  ;;  %p1618_p6 = scmp.lt.s32.totalorder %s211_s1, %s1616_s10 }
  0x3f   : > { %p1614_p2 = pneg %p1613_p1  ;;  %p1619_p7 = scmp.lt.s32.totalorder %s1617_s25, %s1610_s19 }
  0x41   : > { %p1620_p10 = por %p1619_p7, %p1618_p6 }
  0x43   : > { %p1621_p11 = pnand %p1620_p10, %p1614_p2 }
  0x45   : > { %1624 = shalt.err (!%p1621_p11)
}
  0x46   : > { %s2603_s15 = smov 512   ;;  %s248_s8 = scalar_lea.vmem [#allocation7], %s1888_s11 }
  0x47   : > { %1478 = dma.hbm_to_vmem [thread:$0]  (!%p1894_p0), %s209_s13, 8192, %s211_s1, %s197_s5, %s2603_s15, %s1763_s6, %s1764_s7  }
  0x48   : > { %s258_s27 = sshll.u32 %s248_s8, 4  ;;  %s1766_s19 = smov [#allocation7]   ;;  %s259_s27 = int_to_ptr.vmem [resolvable:$true] %s258_s27 }
  0x49   : > { %s1638_s12 = scalar_lea.vmem %s259_s27, 8192  ;;  %s1643_s25 = sshll.u32 %s1766_s19, 4  ;;  %s1644_s25 = int_to_ptr.vmem [resolvable:$false] %s1643_s25 }
  0x4a   : > { %p1639_p13 = scmp.ne.s32.totalorder %s259_s27, %s1638_s12  ;;  %s1645_s24 = scalar_lea.vmem %s1644_s25, 16384 }
  0x4b   : > { %p1646_p2 = scmp.lt.s32.totalorder %s259_s27, %s1644_s25  ;;  %p1647_p6 = scmp.lt.s32.totalorder %s1645_s24, %s1638_s12 }
  0x4c   : > { %p1641_p5 = pnand %p1639_p13, %p1571_p3 }
  0x4d   : > { %p1648_p7 = por %p1647_p6, %p1646_p2 }
  0x4e   : > { %p1642_p1 = pneg %p1641_p5 }
  0x50   : > { %p1649_p10 = pnand %p1648_p7, %p1642_p1 }
  0x52   : > { %1652 = shalt.err (!%p1649_p10)
}
  0x53   : > { %1484 = dma.hbm_to_vmem [thread:$0]  (!%p1894_p0), %s257_s4, 8192, %s259_s27, %s1908_s29, %s2603_s15, %s1763_s6, %s1764_s7  }
  0x54   : > { %s1246_s13 = sshll.u32 %s1755_s21, 1  ;;  %s1457_s26 = sshll.u32 %s1751_s20, 7 }
  0x55   : > { %s279_s10 = sadd.s32 %s1457_s26, %s1246_s13  ;;  %s272_s8 = scalar_lea.vmem [#allocation8], %s1888_s11 }
  0x56   : > { %s282_s12 = sshll.u32 %s272_s8, 4  ;;  %s1248_s19 = sshll.u32 %s279_s10, 7  ;;  %s283_s12 = int_to_ptr.vmem [resolvable:$true] %s282_s12 }
  0x57   : > { %s281_s0 = scalar_lea.hbm %s2573_s3, %s1248_s19  ;;  %s269_s1 = scalar_lea.sflag [#allocation9], %s1882_s9 }
  0x58   : > { %s1666_s5 = scalar_lea.vmem %s283_s12, 8192  ;;  %s1767_s28 = smov [#allocation8]  }
  0x59   : > { %p1667_p11 = scmp.ne.s32.totalorder %s283_s12, %s1666_s5  ;;  %s1671_s4 = sshll.u32 %s1767_s28, 4  ;;  %s1672_s4 = int_to_ptr.vmem [resolvable:$false] %s1671_s4 }
  0x5a   : > { %s1673_s29 = scalar_lea.vmem %s1672_s4, 16384  ;;  %p1674_p1 = scmp.lt.s32.totalorder %s283_s12, %s1672_s4 }
  0x5b   : > { %p1669_p13 = pnand %p1667_p11, %p1571_p3  ;;  %p1675_p2 = scmp.lt.s32.totalorder %s1673_s29, %s1666_s5 }
  0x5d   : > { %p1670_p5 = pneg %p1669_p13  ;;  %p1676_p6 = por %p1675_p2, %p1674_p1 }
  0x5f   : > { %p1677_p7 = pnand %p1676_p6, %p1670_p5 }
  0x61   : > { %1680 = shalt.err (!%p1677_p7)
}
  0x62   : > { %1487 = dma.hbm_to_vmem [thread:$0]  (!%p1894_p0), %s281_s0, 8192, %s283_s12, %s269_s1, %s2603_s15, %s1763_s6, %s1764_s7  }
  0x63   : > { %294 = sbr.rel (%p1925_p4) target bundleno = 470 (0x1d6), region = 36  ;;  %s1980_s9 = sand.u32 (!%p1925_p4), 1, %s1735_s16  }
  0x64   : > { %s1250_s11 = sshll.u32 (!%p1925_p4), %s1980_s9, 9  ;;  %s297_s27 = scalar_lea.sflag (!%p1925_p4), [#allocation3], %s1980_s9 }
  0x65   : > { %s1984_s13 = scalar_lea.vmem (!%p1925_p4), [#allocation2], %s1250_s11 }
  0x68   : > { %1714 = dma.done.wait (%p1866_p8), %s297_s27, 8192  }
  0x69   : > { %1716 = vsyncadd (%p1866_p8), %s297_s27, 4294959104  ;;  %s305_s0 = sand.u32 1, %s1842_s23   ;;  %s1991_s6 = scalar_lea.vmem [#allocation5], %s1250_s11 }
  0x6a   : > { %s306_s14 = scalar_lea.sflag [#allocation6], %s305_s0 }
  0x6b   : > { %1718 = dma.done.wait (%p1866_p8), %s306_s14, 16384  }
  0x6c   : > { %1720 = vsyncadd (%p1866_p8), %s306_s14, 4294950912  ;;  %s1997_s7 = scalar_lea.vmem [#allocation7], %s1250_s11  ;;  %s324_s17 = scalar_lea.sflag [#allocation9], %s1980_s9 }
  0x6d   : > { %s2000_s15 = scalar_lea.vmem [#allocation8], %s1250_s11 }
  0x6e   : > { %1722 = dma.done.wait (%p1866_p8), %s324_s17, 8192  }
  0x6f   : > { %1724 = vsyncadd (%p1866_p8), %s324_s17, 4294959104  ;;  %s1254_s23 = sshll.u32 %s1980_s9, 11  ;;  %v377_v0 = vld [vmem:[%s1984_s13] sm:$0xff]  ;;  %v378_v1 = vld [vmem:[%s1984_s13 + $0x8] sm:$0xff]  ;;  %s1021_s26 = scalar_lea.sflag [#allocation4], %s1980_s9 }
  0x70   : > { %v379_v2 = vld [vmem:[%s1984_s13 + $0x10] sm:$0xff]  ;;  %v380_v3 = vld [vmem:[%s1984_s13 + $0x18] sm:$0xff]  ;;  %v381_v4 = vld [vmem:[%s1984_s13 + $0x20] sm:$0xff]  ;;  %s2013_s30 = scalar_lea.vmem [#allocation10], %s1254_s23 }
  0x71   : > { %v382_v5 = vld [vmem:[%s1984_s13 + $0x28] sm:$0xff]  ;;  %441 = vst [vmem:[%s2013_s30] sm:$0xff] %v377_v0  ;;  %442 = vst [vmem:[%s2013_s30 + $0x8] sm:$0xff] %v378_v1  ;;  %v383_v6 = vld [vmem:[%s1984_s13 + $0x30] sm:$0xff] }
  0x72   : > { %443 = vst [vmem:[%s2013_s30 + $0x10] sm:$0xff] %v379_v2  ;;  %v384_v7 = vld [vmem:[%s1984_s13 + $0x38] sm:$0xff]  ;;  %v385_v8 = vld [vmem:[%s1984_s13 + $0x40] sm:$0xff]  ;;  %444 = vst [vmem:[%s2013_s30 + $0x18] sm:$0xff] %v380_v3 }
  0x73   : > { %445 = vst [vmem:[%s2013_s30 + $0x20] sm:$0xff] %v381_v4  ;;  %446 = vst [vmem:[%s2013_s30 + $0x28] sm:$0xff] %v382_v5  ;;  %v386_v9 = vld [vmem:[%s1984_s13 + $0x48] sm:$0xff]  ;;  %v387_v10 = vld [vmem:[%s1984_s13 + $0x50] sm:$0xff] }
  0x74   : > { %v388_v11 = vld [vmem:[%s1984_s13 + $0x58] sm:$0xff]  ;;  %447 = vst [vmem:[%s2013_s30 + $0x30] sm:$0xff] %v383_v6  ;;  %448 = vst [vmem:[%s2013_s30 + $0x38] sm:$0xff] %v384_v7  ;;  %v389_v12 = vld [vmem:[%s1984_s13 + $0x60] sm:$0xff] }
  0x75   : > { %449 = vst [vmem:[%s2013_s30 + $0x40] sm:$0xff] %v385_v8  ;;  %v390_v13 = vld [vmem:[%s1984_s13 + $0x68] sm:$0xff]  ;;  %v391_v14 = vld [vmem:[%s1984_s13 + $0x70] sm:$0xff]  ;;  %450 = vst [vmem:[%s2013_s30 + $0x48] sm:$0xff] %v386_v9 }
  0x76   : > { %451 = vst [vmem:[%s2013_s30 + $0x50] sm:$0xff] %v387_v10  ;;  %452 = vst [vmem:[%s2013_s30 + $0x58] sm:$0xff] %v388_v11  ;;  %v392_v15 = vld [vmem:[%s1984_s13 + $0x78] sm:$0xff]  ;;  %v393_v16 = vld [vmem:[%s1984_s13 + $0x80] sm:$0xff] }
  0x77   : > { %v394_v17 = vld [vmem:[%s1984_s13 + $0x88] sm:$0xff]  ;;  %453 = vst [vmem:[%s2013_s30 + $0x60] sm:$0xff] %v389_v12  ;;  %454 = vst [vmem:[%s2013_s30 + $0x68] sm:$0xff] %v390_v13  ;;  %v395_v18 = vld [vmem:[%s1984_s13 + $0x90] sm:$0xff] }
  0x78   : > { %455 = vst [vmem:[%s2013_s30 + $0x70] sm:$0xff] %v391_v14  ;;  %v396_v19 = vld [vmem:[%s1984_s13 + $0x98] sm:$0xff]  ;;  %v397_v20 = vld [vmem:[%s1984_s13 + $0xa0] sm:$0xff]  ;;  %456 = vst [vmem:[%s2013_s30 + $0x78] sm:$0xff] %v392_v15 }
  0x79   : > { %457 = vst [vmem:[%s2013_s30 + $0x80] sm:$0xff] %v393_v16  ;;  %458 = vst [vmem:[%s2013_s30 + $0x88] sm:$0xff] %v394_v17  ;;  %v398_v21 = vld [vmem:[%s1984_s13 + $0xa8] sm:$0xff]  ;;  %v399_v22 = vld [vmem:[%s1984_s13 + $0xb0] sm:$0xff] }
  0x7a   : > { %v400_v23 = vld [vmem:[%s1984_s13 + $0xb8] sm:$0xff]  ;;  %459 = vst [vmem:[%s2013_s30 + $0x90] sm:$0xff] %v395_v18  ;;  %460 = vst [vmem:[%s2013_s30 + $0x98] sm:$0xff] %v396_v19  ;;  %v401_v24 = vld [vmem:[%s1984_s13 + $0xc0] sm:$0xff] }
  0x7b   : > { %461 = vst [vmem:[%s2013_s30 + $0xa0] sm:$0xff] %v397_v20  ;;  %v402_v25 = vld [vmem:[%s1984_s13 + $0xc8] sm:$0xff]  ;;  %v403_v26 = vld [vmem:[%s1984_s13 + $0xd0] sm:$0xff]  ;;  %462 = vst [vmem:[%s2013_s30 + $0xa8] sm:$0xff] %v398_v21 }
  0x7c   : > { %463 = vst [vmem:[%s2013_s30 + $0xb0] sm:$0xff] %v399_v22  ;;  %464 = vst [vmem:[%s2013_s30 + $0xb8] sm:$0xff] %v400_v23  ;;  %v404_v27 = vld [vmem:[%s1984_s13 + $0xd8] sm:$0xff]  ;;  %v405_v28 = vld [vmem:[%s1984_s13 + $0xe0] sm:$0xff] }
  0x7d   : > { %v406_v29 = vld [vmem:[%s1984_s13 + $0xe8] sm:$0xff]  ;;  %465 = vst [vmem:[%s2013_s30 + $0xc0] sm:$0xff] %v401_v24  ;;  %466 = vst [vmem:[%s2013_s30 + $0xc8] sm:$0xff] %v402_v25  ;;  %v407_v30 = vld [vmem:[%s1984_s13 + $0xf0] sm:$0xff] }
  0x7e   : > { %467 = vst [vmem:[%s2013_s30 + $0xd0] sm:$0xff] %v403_v26  ;;  %v408_v31 = vld [vmem:[%s1984_s13 + $0xf8] sm:$0xff]  ;;  %v409_v32 = vld [vmem:[%s1984_s13 + $0x100] sm:$0xff]  ;;  %468 = vst [vmem:[%s2013_s30 + $0xd8] sm:$0xff] %v404_v27 }
  0x7f   : > { %469 = vst [vmem:[%s2013_s30 + $0xe0] sm:$0xff] %v405_v28  ;;  %470 = vst [vmem:[%s2013_s30 + $0xe8] sm:$0xff] %v406_v29  ;;  %v410_v33 = vld [vmem:[%s1984_s13 + $0x108] sm:$0xff]  ;;  %v411_v34 = vld [vmem:[%s1984_s13 + $0x110] sm:$0xff] }
  0x80   : > { %v412_v35 = vld [vmem:[%s1984_s13 + $0x118] sm:$0xff]  ;;  %471 = vst [vmem:[%s2013_s30 + $0xf0] sm:$0xff] %v407_v30  ;;  %472 = vst [vmem:[%s2013_s30 + $0xf8] sm:$0xff] %v408_v31  ;;  %v413_v36 = vld [vmem:[%s1984_s13 + $0x120] sm:$0xff] }
  0x81   : > { %473 = vst [vmem:[%s2013_s30 + $0x100] sm:$0xff] %v409_v32  ;;  %v414_v37 = vld [vmem:[%s1984_s13 + $0x128] sm:$0xff]  ;;  %v415_v38 = vld [vmem:[%s1984_s13 + $0x130] sm:$0xff]  ;;  %474 = vst [vmem:[%s2013_s30 + $0x108] sm:$0xff] %v410_v33 }
  0x82   : > { %475 = vst [vmem:[%s2013_s30 + $0x110] sm:$0xff] %v411_v34  ;;  %476 = vst [vmem:[%s2013_s30 + $0x118] sm:$0xff] %v412_v35  ;;  %v416_v39 = vld [vmem:[%s1984_s13 + $0x138] sm:$0xff]  ;;  %v417_v40 = vld [vmem:[%s1984_s13 + $0x140] sm:$0xff] }
  0x83   : > { %v418_v41 = vld [vmem:[%s1984_s13 + $0x148] sm:$0xff]  ;;  %477 = vst [vmem:[%s2013_s30 + $0x120] sm:$0xff] %v413_v36  ;;  %478 = vst [vmem:[%s2013_s30 + $0x128] sm:$0xff] %v414_v37  ;;  %v419_v42 = vld [vmem:[%s1984_s13 + $0x150] sm:$0xff] }
  0x84   : > { %479 = vst [vmem:[%s2013_s30 + $0x130] sm:$0xff] %v415_v38  ;;  %v420_v43 = vld [vmem:[%s1984_s13 + $0x158] sm:$0xff]  ;;  %v421_v44 = vld [vmem:[%s1984_s13 + $0x160] sm:$0xff]  ;;  %480 = vst [vmem:[%s2013_s30 + $0x138] sm:$0xff] %v416_v39 }
  0x85   : > { %481 = vst [vmem:[%s2013_s30 + $0x140] sm:$0xff] %v417_v40  ;;  %482 = vst [vmem:[%s2013_s30 + $0x148] sm:$0xff] %v418_v41  ;;  %v422_v45 = vld [vmem:[%s1984_s13 + $0x168] sm:$0xff]  ;;  %v423_v46 = vld [vmem:[%s1984_s13 + $0x170] sm:$0xff] }
  0x86   : > { %v424_v47 = vld [vmem:[%s1984_s13 + $0x178] sm:$0xff]  ;;  %483 = vst [vmem:[%s2013_s30 + $0x150] sm:$0xff] %v419_v42  ;;  %484 = vst [vmem:[%s2013_s30 + $0x158] sm:$0xff] %v420_v43  ;;  %v425_v48 = vld [vmem:[%s1984_s13 + $0x180] sm:$0xff] }
  0x87   : > { %485 = vst [vmem:[%s2013_s30 + $0x160] sm:$0xff] %v421_v44  ;;  %v426_v49 = vld [vmem:[%s1984_s13 + $0x188] sm:$0xff]  ;;  %v427_v50 = vld [vmem:[%s1984_s13 + $0x190] sm:$0xff]  ;;  %486 = vst [vmem:[%s2013_s30 + $0x168] sm:$0xff] %v422_v45 }
  0x88   : > { %487 = vst [vmem:[%s2013_s30 + $0x170] sm:$0xff] %v423_v46  ;;  %488 = vst [vmem:[%s2013_s30 + $0x178] sm:$0xff] %v424_v47  ;;  %v428_v51 = vld [vmem:[%s1984_s13 + $0x198] sm:$0xff]  ;;  %v429_v52 = vld [vmem:[%s1984_s13 + $0x1a0] sm:$0xff] }
  0x89   : > { %v430_v53 = vld [vmem:[%s1984_s13 + $0x1a8] sm:$0xff]  ;;  %489 = vst [vmem:[%s2013_s30 + $0x180] sm:$0xff] %v425_v48  ;;  %490 = vst [vmem:[%s2013_s30 + $0x188] sm:$0xff] %v426_v49  ;;  %v431_v54 = vld [vmem:[%s1984_s13 + $0x1b0] sm:$0xff] }
  0x8a   : > { %491 = vst [vmem:[%s2013_s30 + $0x190] sm:$0xff] %v427_v50  ;;  %v432_v55 = vld [vmem:[%s1984_s13 + $0x1b8] sm:$0xff]  ;;  %v433_v56 = vld [vmem:[%s1984_s13 + $0x1c0] sm:$0xff]  ;;  %492 = vst [vmem:[%s2013_s30 + $0x198] sm:$0xff] %v428_v51 }
  0x8b   : > { %493 = vst [vmem:[%s2013_s30 + $0x1a0] sm:$0xff] %v429_v52  ;;  %494 = vst [vmem:[%s2013_s30 + $0x1a8] sm:$0xff] %v430_v53  ;;  %v434_v57 = vld [vmem:[%s1984_s13 + $0x1c8] sm:$0xff]  ;;  %v435_v58 = vld [vmem:[%s1984_s13 + $0x1d0] sm:$0xff] }
  0x8c   : > { %v436_v59 = vld [vmem:[%s1984_s13 + $0x1d8] sm:$0xff]  ;;  %495 = vst [vmem:[%s2013_s30 + $0x1b0] sm:$0xff] %v431_v54  ;;  %496 = vst [vmem:[%s2013_s30 + $0x1b8] sm:$0xff] %v432_v55  ;;  %v437_v60 = vld [vmem:[%s1984_s13 + $0x1e0] sm:$0xff] }
  0x8d   : > { %497 = vst [vmem:[%s2013_s30 + $0x1c0] sm:$0xff] %v433_v56  ;;  %v438_v61 = vld [vmem:[%s1984_s13 + $0x1e8] sm:$0xff]  ;;  %v439_v62 = vld [vmem:[%s1984_s13 + $0x1f0] sm:$0xff]  ;;  %498 = vst [vmem:[%s2013_s30 + $0x1c8] sm:$0xff] %v434_v57 }
  0x8e   : > { %499 = vst [vmem:[%s2013_s30 + $0x1d0] sm:$0xff] %v435_v58  ;;  %500 = vst [vmem:[%s2013_s30 + $0x1d8] sm:$0xff] %v436_v59  ;;  %v440_v63 = vld [vmem:[%s1984_s13 + $0x1f8] sm:$0xff]  ;;  %v505_v0 = vld [vmem:[%s1991_s6] sm:$0xff] }
  0x8f   : > { %501 = vst [vmem:[%s2013_s30 + $0x1e0] sm:$0xff] %v437_v60  ;;  %502 = vst [vmem:[%s2013_s30 + $0x1e8] sm:$0xff] %v438_v61  ;;  %v506_v1 = vld [vmem:[%s1991_s6 + $0x8] sm:$0xff]  ;;  %v507_v2 = vld [vmem:[%s1991_s6 + $0x10] sm:$0xff] }
  0x90   : > { %503 = vst [vmem:[%s2013_s30 + $0x1f0] sm:$0xff] %v439_v62  ;;  %504 = vst [vmem:[%s2013_s30 + $0x1f8] sm:$0xff] %v440_v63  ;;  %v508_v3 = vld [vmem:[%s1991_s6 + $0x18] sm:$0xff]  ;;  %v509_v4 = vld [vmem:[%s1991_s6 + $0x20] sm:$0xff] }
  0x91   : > { %1255 = vst [vmem:[%s2013_s30 + $0x200] sm:$0xff] %v505_v0  ;;  %1256 = vst [vmem:[%s2013_s30 + $0x208] sm:$0xff] %v506_v1  ;;  %v510_v5 = vld [vmem:[%s1991_s6 + $0x28] sm:$0xff]  ;;  %v511_v6 = vld [vmem:[%s1991_s6 + $0x30] sm:$0xff] }
  0x92   : > { %v512_v7 = vld [vmem:[%s1991_s6 + $0x38] sm:$0xff]  ;;  %1257 = vst [vmem:[%s2013_s30 + $0x210] sm:$0xff] %v507_v2  ;;  %1258 = vst [vmem:[%s2013_s30 + $0x218] sm:$0xff] %v508_v3  ;;  %v513_v8 = vld [vmem:[%s1991_s6 + $0x40] sm:$0xff] }
  0x93   : > { %1259 = vst [vmem:[%s2013_s30 + $0x220] sm:$0xff] %v509_v4  ;;  %v514_v9 = vld [vmem:[%s1991_s6 + $0x48] sm:$0xff]  ;;  %v515_v10 = vld [vmem:[%s1991_s6 + $0x50] sm:$0xff]  ;;  %1260 = vst [vmem:[%s2013_s30 + $0x228] sm:$0xff] %v510_v5 }
  0x94   : > { %1261 = vst [vmem:[%s2013_s30 + $0x230] sm:$0xff] %v511_v6  ;;  %1262 = vst [vmem:[%s2013_s30 + $0x238] sm:$0xff] %v512_v7  ;;  %v516_v11 = vld [vmem:[%s1991_s6 + $0x58] sm:$0xff]  ;;  %v517_v12 = vld [vmem:[%s1991_s6 + $0x60] sm:$0xff] }
  0x95   : > { %v518_v13 = vld [vmem:[%s1991_s6 + $0x68] sm:$0xff]  ;;  %1263 = vst [vmem:[%s2013_s30 + $0x240] sm:$0xff] %v513_v8  ;;  %1264 = vst [vmem:[%s2013_s30 + $0x248] sm:$0xff] %v514_v9  ;;  %v519_v14 = vld [vmem:[%s1991_s6 + $0x70] sm:$0xff] }
  0x96   : > { %1265 = vst [vmem:[%s2013_s30 + $0x250] sm:$0xff] %v515_v10  ;;  %v520_v15 = vld [vmem:[%s1991_s6 + $0x78] sm:$0xff]  ;;  %v521_v16 = vld [vmem:[%s1991_s6 + $0x80] sm:$0xff]  ;;  %1266 = vst [vmem:[%s2013_s30 + $0x258] sm:$0xff] %v516_v11 }
  0x97   : > { %1267 = vst [vmem:[%s2013_s30 + $0x260] sm:$0xff] %v517_v12  ;;  %1268 = vst [vmem:[%s2013_s30 + $0x268] sm:$0xff] %v518_v13  ;;  %v522_v17 = vld [vmem:[%s1991_s6 + $0x88] sm:$0xff]  ;;  %v523_v18 = vld [vmem:[%s1991_s6 + $0x90] sm:$0xff] }
  0x98   : > { %v524_v19 = vld [vmem:[%s1991_s6 + $0x98] sm:$0xff]  ;;  %1269 = vst [vmem:[%s2013_s30 + $0x270] sm:$0xff] %v519_v14  ;;  %1270 = vst [vmem:[%s2013_s30 + $0x278] sm:$0xff] %v520_v15  ;;  %v525_v20 = vld [vmem:[%s1991_s6 + $0xa0] sm:$0xff] }
  0x99   : > { %1271 = vst [vmem:[%s2013_s30 + $0x280] sm:$0xff] %v521_v16  ;;  %v526_v21 = vld [vmem:[%s1991_s6 + $0xa8] sm:$0xff]  ;;  %v527_v22 = vld [vmem:[%s1991_s6 + $0xb0] sm:$0xff]  ;;  %1272 = vst [vmem:[%s2013_s30 + $0x288] sm:$0xff] %v522_v17 }
  0x9a   : > { %1273 = vst [vmem:[%s2013_s30 + $0x290] sm:$0xff] %v523_v18  ;;  %1274 = vst [vmem:[%s2013_s30 + $0x298] sm:$0xff] %v524_v19  ;;  %v528_v23 = vld [vmem:[%s1991_s6 + $0xb8] sm:$0xff]  ;;  %v529_v24 = vld [vmem:[%s1991_s6 + $0xc0] sm:$0xff] }
  0x9b   : > { %v530_v25 = vld [vmem:[%s1991_s6 + $0xc8] sm:$0xff]  ;;  %1275 = vst [vmem:[%s2013_s30 + $0x2a0] sm:$0xff] %v525_v20  ;;  %1276 = vst [vmem:[%s2013_s30 + $0x2a8] sm:$0xff] %v526_v21  ;;  %v531_v26 = vld [vmem:[%s1991_s6 + $0xd0] sm:$0xff] }
  0x9c   : > { %1277 = vst [vmem:[%s2013_s30 + $0x2b0] sm:$0xff] %v527_v22  ;;  %v532_v27 = vld [vmem:[%s1991_s6 + $0xd8] sm:$0xff]  ;;  %v533_v28 = vld [vmem:[%s1991_s6 + $0xe0] sm:$0xff]  ;;  %1278 = vst [vmem:[%s2013_s30 + $0x2b8] sm:$0xff] %v528_v23 }
  0x9d   : > { %1279 = vst [vmem:[%s2013_s30 + $0x2c0] sm:$0xff] %v529_v24  ;;  %1280 = vst [vmem:[%s2013_s30 + $0x2c8] sm:$0xff] %v530_v25  ;;  %v534_v29 = vld [vmem:[%s1991_s6 + $0xe8] sm:$0xff]  ;;  %v535_v30 = vld [vmem:[%s1991_s6 + $0xf0] sm:$0xff] }
  0x9e   : > { %v536_v31 = vld [vmem:[%s1991_s6 + $0xf8] sm:$0xff]  ;;  %1281 = vst [vmem:[%s2013_s30 + $0x2d0] sm:$0xff] %v531_v26  ;;  %1282 = vst [vmem:[%s2013_s30 + $0x2d8] sm:$0xff] %v532_v27  ;;  %v537_v32 = vld [vmem:[%s1991_s6 + $0x100] sm:$0xff] }
  0x9f   : > { %1283 = vst [vmem:[%s2013_s30 + $0x2e0] sm:$0xff] %v533_v28  ;;  %v538_v33 = vld [vmem:[%s1991_s6 + $0x108] sm:$0xff]  ;;  %v539_v34 = vld [vmem:[%s1991_s6 + $0x110] sm:$0xff]  ;;  %1284 = vst [vmem:[%s2013_s30 + $0x2e8] sm:$0xff] %v534_v29 }
  0xa0   : > { %1285 = vst [vmem:[%s2013_s30 + $0x2f0] sm:$0xff] %v535_v30  ;;  %1286 = vst [vmem:[%s2013_s30 + $0x2f8] sm:$0xff] %v536_v31  ;;  %v540_v35 = vld [vmem:[%s1991_s6 + $0x118] sm:$0xff]  ;;  %v541_v36 = vld [vmem:[%s1991_s6 + $0x120] sm:$0xff] }
  0xa1   : > { %v542_v37 = vld [vmem:[%s1991_s6 + $0x128] sm:$0xff]  ;;  %1287 = vst [vmem:[%s2013_s30 + $0x300] sm:$0xff] %v537_v32  ;;  %1288 = vst [vmem:[%s2013_s30 + $0x308] sm:$0xff] %v538_v33  ;;  %v543_v38 = vld [vmem:[%s1991_s6 + $0x130] sm:$0xff] }
  0xa2   : > { %1289 = vst [vmem:[%s2013_s30 + $0x310] sm:$0xff] %v539_v34  ;;  %v544_v39 = vld [vmem:[%s1991_s6 + $0x138] sm:$0xff]  ;;  %v545_v40 = vld [vmem:[%s1991_s6 + $0x140] sm:$0xff]  ;;  %1290 = vst [vmem:[%s2013_s30 + $0x318] sm:$0xff] %v540_v35 }
  0xa3   : > { %1291 = vst [vmem:[%s2013_s30 + $0x320] sm:$0xff] %v541_v36  ;;  %1292 = vst [vmem:[%s2013_s30 + $0x328] sm:$0xff] %v542_v37  ;;  %v546_v41 = vld [vmem:[%s1991_s6 + $0x148] sm:$0xff]  ;;  %v547_v42 = vld [vmem:[%s1991_s6 + $0x150] sm:$0xff] }
  0xa4   : > { %v548_v43 = vld [vmem:[%s1991_s6 + $0x158] sm:$0xff]  ;;  %1293 = vst [vmem:[%s2013_s30 + $0x330] sm:$0xff] %v543_v38  ;;  %1294 = vst [vmem:[%s2013_s30 + $0x338] sm:$0xff] %v544_v39  ;;  %v549_v44 = vld [vmem:[%s1991_s6 + $0x160] sm:$0xff] }
  0xa5   : > { %1295 = vst [vmem:[%s2013_s30 + $0x340] sm:$0xff] %v545_v40  ;;  %v550_v45 = vld [vmem:[%s1991_s6 + $0x168] sm:$0xff]  ;;  %v551_v46 = vld [vmem:[%s1991_s6 + $0x170] sm:$0xff]  ;;  %1296 = vst [vmem:[%s2013_s30 + $0x348] sm:$0xff] %v546_v41 }
  0xa6   : > { %1297 = vst [vmem:[%s2013_s30 + $0x350] sm:$0xff] %v547_v42  ;;  %1298 = vst [vmem:[%s2013_s30 + $0x358] sm:$0xff] %v548_v43  ;;  %v552_v47 = vld [vmem:[%s1991_s6 + $0x178] sm:$0xff]  ;;  %v553_v48 = vld [vmem:[%s1991_s6 + $0x180] sm:$0xff] }
  0xa7   : > { %v554_v49 = vld [vmem:[%s1991_s6 + $0x188] sm:$0xff]  ;;  %1299 = vst [vmem:[%s2013_s30 + $0x360] sm:$0xff] %v549_v44  ;;  %1300 = vst [vmem:[%s2013_s30 + $0x368] sm:$0xff] %v550_v45  ;;  %v555_v50 = vld [vmem:[%s1991_s6 + $0x190] sm:$0xff] }
  0xa8   : > { %1301 = vst [vmem:[%s2013_s30 + $0x370] sm:$0xff] %v551_v46  ;;  %v556_v51 = vld [vmem:[%s1991_s6 + $0x198] sm:$0xff]  ;;  %v557_v52 = vld [vmem:[%s1991_s6 + $0x1a0] sm:$0xff]  ;;  %1302 = vst [vmem:[%s2013_s30 + $0x378] sm:$0xff] %v552_v47 }
  0xa9   : > { %1303 = vst [vmem:[%s2013_s30 + $0x380] sm:$0xff] %v553_v48  ;;  %1304 = vst [vmem:[%s2013_s30 + $0x388] sm:$0xff] %v554_v49  ;;  %v558_v53 = vld [vmem:[%s1991_s6 + $0x1a8] sm:$0xff]  ;;  %v559_v54 = vld [vmem:[%s1991_s6 + $0x1b0] sm:$0xff] }
  0xaa   : > { %v560_v55 = vld [vmem:[%s1991_s6 + $0x1b8] sm:$0xff]  ;;  %1305 = vst [vmem:[%s2013_s30 + $0x390] sm:$0xff] %v555_v50  ;;  %1306 = vst [vmem:[%s2013_s30 + $0x398] sm:$0xff] %v556_v51  ;;  %v561_v56 = vld [vmem:[%s1991_s6 + $0x1c0] sm:$0xff] }
  0xab   : > { %1307 = vst [vmem:[%s2013_s30 + $0x3a0] sm:$0xff] %v557_v52  ;;  %v562_v57 = vld [vmem:[%s1991_s6 + $0x1c8] sm:$0xff]  ;;  %v563_v58 = vld [vmem:[%s1991_s6 + $0x1d0] sm:$0xff]  ;;  %1308 = vst [vmem:[%s2013_s30 + $0x3a8] sm:$0xff] %v558_v53 }
  0xac   : > { %1309 = vst [vmem:[%s2013_s30 + $0x3b0] sm:$0xff] %v559_v54  ;;  %1310 = vst [vmem:[%s2013_s30 + $0x3b8] sm:$0xff] %v560_v55  ;;  %v564_v59 = vld [vmem:[%s1991_s6 + $0x1d8] sm:$0xff]  ;;  %v565_v60 = vld [vmem:[%s1991_s6 + $0x1e0] sm:$0xff] }
  0xad   : > { %v566_v61 = vld [vmem:[%s1991_s6 + $0x1e8] sm:$0xff]  ;;  %1311 = vst [vmem:[%s2013_s30 + $0x3c0] sm:$0xff] %v561_v56  ;;  %1312 = vst [vmem:[%s2013_s30 + $0x3c8] sm:$0xff] %v562_v57  ;;  %v567_v62 = vld [vmem:[%s1991_s6 + $0x1f0] sm:$0xff] }
  0xae   : > { %1313 = vst [vmem:[%s2013_s30 + $0x3d0] sm:$0xff] %v563_v58  ;;  %v568_v63 = vld [vmem:[%s1991_s6 + $0x1f8] sm:$0xff]  ;;  %1314 = vst [vmem:[%s2013_s30 + $0x3d8] sm:$0xff] %v564_v59  ;;  %v634_v0 = vld [vmem:[%s1997_s7] sm:$0xff] }
  0xaf   : > { %1315 = vst [vmem:[%s2013_s30 + $0x3e0] sm:$0xff] %v565_v60  ;;  %1316 = vst [vmem:[%s2013_s30 + $0x3e8] sm:$0xff] %v566_v61  ;;  %v635_v1 = vld [vmem:[%s1997_s7 + $0x8] sm:$0xff]  ;;  %v636_v2 = vld [vmem:[%s1997_s7 + $0x10] sm:$0xff] }
  0xb0   : > { %1317 = vst [vmem:[%s2013_s30 + $0x3f0] sm:$0xff] %v567_v62  ;;  %1318 = vst [vmem:[%s2013_s30 + $0x3f8] sm:$0xff] %v568_v63  ;;  %v637_v3 = vld [vmem:[%s1997_s7 + $0x18] sm:$0xff]  ;;  %v638_v4 = vld [vmem:[%s1997_s7 + $0x20] sm:$0xff] }
  0xb1   : > { %1319 = vst [vmem:[%s2013_s30 + $0x400] sm:$0xff] %v634_v0  ;;  %v639_v5 = vld [vmem:[%s1997_s7 + $0x28] sm:$0xff]  ;;  %v640_v6 = vld [vmem:[%s1997_s7 + $0x30] sm:$0xff]  ;;  %1320 = vst [vmem:[%s2013_s30 + $0x408] sm:$0xff] %v635_v1 }
  0xb2   : > { %1321 = vst [vmem:[%s2013_s30 + $0x410] sm:$0xff] %v636_v2  ;;  %1322 = vst [vmem:[%s2013_s30 + $0x418] sm:$0xff] %v637_v3  ;;  %v641_v7 = vld [vmem:[%s1997_s7 + $0x38] sm:$0xff]  ;;  %v642_v8 = vld [vmem:[%s1997_s7 + $0x40] sm:$0xff] }
  0xb3   : > { %v643_v9 = vld [vmem:[%s1997_s7 + $0x48] sm:$0xff]  ;;  %1323 = vst [vmem:[%s2013_s30 + $0x420] sm:$0xff] %v638_v4  ;;  %1324 = vst [vmem:[%s2013_s30 + $0x428] sm:$0xff] %v639_v5  ;;  %v644_v10 = vld [vmem:[%s1997_s7 + $0x50] sm:$0xff] }
  0xb4   : > { %1325 = vst [vmem:[%s2013_s30 + $0x430] sm:$0xff] %v640_v6  ;;  %v645_v11 = vld [vmem:[%s1997_s7 + $0x58] sm:$0xff]  ;;  %v646_v12 = vld [vmem:[%s1997_s7 + $0x60] sm:$0xff]  ;;  %1326 = vst [vmem:[%s2013_s30 + $0x438] sm:$0xff] %v641_v7 }
  0xb5   : > { %1327 = vst [vmem:[%s2013_s30 + $0x440] sm:$0xff] %v642_v8  ;;  %1328 = vst [vmem:[%s2013_s30 + $0x448] sm:$0xff] %v643_v9  ;;  %v647_v13 = vld [vmem:[%s1997_s7 + $0x68] sm:$0xff]  ;;  %v648_v14 = vld [vmem:[%s1997_s7 + $0x70] sm:$0xff] }
  0xb6   : > { %v649_v15 = vld [vmem:[%s1997_s7 + $0x78] sm:$0xff]  ;;  %1329 = vst [vmem:[%s2013_s30 + $0x450] sm:$0xff] %v644_v10  ;;  %1330 = vst [vmem:[%s2013_s30 + $0x458] sm:$0xff] %v645_v11  ;;  %v650_v16 = vld [vmem:[%s1997_s7 + $0x80] sm:$0xff] }
  0xb7   : > { %1331 = vst [vmem:[%s2013_s30 + $0x460] sm:$0xff] %v646_v12  ;;  %v651_v17 = vld [vmem:[%s1997_s7 + $0x88] sm:$0xff]  ;;  %v652_v18 = vld [vmem:[%s1997_s7 + $0x90] sm:$0xff]  ;;  %1332 = vst [vmem:[%s2013_s30 + $0x468] sm:$0xff] %v647_v13 }
  0xb8   : > { %1333 = vst [vmem:[%s2013_s30 + $0x470] sm:$0xff] %v648_v14  ;;  %1334 = vst [vmem:[%s2013_s30 + $0x478] sm:$0xff] %v649_v15  ;;  %v653_v19 = vld [vmem:[%s1997_s7 + $0x98] sm:$0xff]  ;;  %v654_v20 = vld [vmem:[%s1997_s7 + $0xa0] sm:$0xff] }
  0xb9   : > { %v655_v21 = vld [vmem:[%s1997_s7 + $0xa8] sm:$0xff]  ;;  %1335 = vst [vmem:[%s2013_s30 + $0x480] sm:$0xff] %v650_v16  ;;  %1336 = vst [vmem:[%s2013_s30 + $0x488] sm:$0xff] %v651_v17  ;;  %v656_v22 = vld [vmem:[%s1997_s7 + $0xb0] sm:$0xff] }
  0xba   : > { %1337 = vst [vmem:[%s2013_s30 + $0x490] sm:$0xff] %v652_v18  ;;  %v657_v23 = vld [vmem:[%s1997_s7 + $0xb8] sm:$0xff]  ;;  %v658_v24 = vld [vmem:[%s1997_s7 + $0xc0] sm:$0xff]  ;;  %1338 = vst [vmem:[%s2013_s30 + $0x498] sm:$0xff] %v653_v19 }
  0xbb   : > { %1339 = vst [vmem:[%s2013_s30 + $0x4a0] sm:$0xff] %v654_v20  ;;  %1340 = vst [vmem:[%s2013_s30 + $0x4a8] sm:$0xff] %v655_v21  ;;  %v659_v25 = vld [vmem:[%s1997_s7 + $0xc8] sm:$0xff]  ;;  %v660_v26 = vld [vmem:[%s1997_s7 + $0xd0] sm:$0xff] }
  0xbc   : > { %v661_v27 = vld [vmem:[%s1997_s7 + $0xd8] sm:$0xff]  ;;  %1341 = vst [vmem:[%s2013_s30 + $0x4b0] sm:$0xff] %v656_v22  ;;  %1342 = vst [vmem:[%s2013_s30 + $0x4b8] sm:$0xff] %v657_v23  ;;  %v662_v28 = vld [vmem:[%s1997_s7 + $0xe0] sm:$0xff] }
  0xbd   : > { %1343 = vst [vmem:[%s2013_s30 + $0x4c0] sm:$0xff] %v658_v24  ;;  %v663_v29 = vld [vmem:[%s1997_s7 + $0xe8] sm:$0xff]  ;;  %v664_v30 = vld [vmem:[%s1997_s7 + $0xf0] sm:$0xff]  ;;  %1344 = vst [vmem:[%s2013_s30 + $0x4c8] sm:$0xff] %v659_v25 }
  0xbe   : > { %1345 = vst [vmem:[%s2013_s30 + $0x4d0] sm:$0xff] %v660_v26  ;;  %1346 = vst [vmem:[%s2013_s30 + $0x4d8] sm:$0xff] %v661_v27  ;;  %v665_v31 = vld [vmem:[%s1997_s7 + $0xf8] sm:$0xff]  ;;  %v666_v32 = vld [vmem:[%s1997_s7 + $0x100] sm:$0xff] }
  0xbf   : > { %v667_v33 = vld [vmem:[%s1997_s7 + $0x108] sm:$0xff]  ;;  %1347 = vst [vmem:[%s2013_s30 + $0x4e0] sm:$0xff] %v662_v28  ;;  %1348 = vst [vmem:[%s2013_s30 + $0x4e8] sm:$0xff] %v663_v29  ;;  %v668_v34 = vld [vmem:[%s1997_s7 + $0x110] sm:$0xff] }
  0xc0   : > { %1349 = vst [vmem:[%s2013_s30 + $0x4f0] sm:$0xff] %v664_v30  ;;  %v669_v35 = vld [vmem:[%s1997_s7 + $0x118] sm:$0xff]  ;;  %v670_v36 = vld [vmem:[%s1997_s7 + $0x120] sm:$0xff]  ;;  %1350 = vst [vmem:[%s2013_s30 + $0x4f8] sm:$0xff] %v665_v31 }
  0xc1   : > { %1351 = vst [vmem:[%s2013_s30 + $0x500] sm:$0xff] %v666_v32  ;;  %1352 = vst [vmem:[%s2013_s30 + $0x508] sm:$0xff] %v667_v33  ;;  %v671_v37 = vld [vmem:[%s1997_s7 + $0x128] sm:$0xff]  ;;  %v672_v38 = vld [vmem:[%s1997_s7 + $0x130] sm:$0xff] }
  0xc2   : > { %v673_v39 = vld [vmem:[%s1997_s7 + $0x138] sm:$0xff]  ;;  %1353 = vst [vmem:[%s2013_s30 + $0x510] sm:$0xff] %v668_v34  ;;  %1354 = vst [vmem:[%s2013_s30 + $0x518] sm:$0xff] %v669_v35  ;;  %v674_v40 = vld [vmem:[%s1997_s7 + $0x140] sm:$0xff] }
  0xc3   : > { %1355 = vst [vmem:[%s2013_s30 + $0x520] sm:$0xff] %v670_v36  ;;  %v675_v41 = vld [vmem:[%s1997_s7 + $0x148] sm:$0xff]  ;;  %v676_v42 = vld [vmem:[%s1997_s7 + $0x150] sm:$0xff]  ;;  %1356 = vst [vmem:[%s2013_s30 + $0x528] sm:$0xff] %v671_v37 }
  0xc4   : > { %1357 = vst [vmem:[%s2013_s30 + $0x530] sm:$0xff] %v672_v38  ;;  %1358 = vst [vmem:[%s2013_s30 + $0x538] sm:$0xff] %v673_v39  ;;  %v677_v43 = vld [vmem:[%s1997_s7 + $0x158] sm:$0xff]  ;;  %v678_v44 = vld [vmem:[%s1997_s7 + $0x160] sm:$0xff] }
  0xc5   : > { %v679_v45 = vld [vmem:[%s1997_s7 + $0x168] sm:$0xff]  ;;  %1359 = vst [vmem:[%s2013_s30 + $0x540] sm:$0xff] %v674_v40  ;;  %1360 = vst [vmem:[%s2013_s30 + $0x548] sm:$0xff] %v675_v41  ;;  %v680_v46 = vld [vmem:[%s1997_s7 + $0x170] sm:$0xff] }
  0xc6   : > { %1361 = vst [vmem:[%s2013_s30 + $0x550] sm:$0xff] %v676_v42  ;;  %v681_v47 = vld [vmem:[%s1997_s7 + $0x178] sm:$0xff]  ;;  %v682_v48 = vld [vmem:[%s1997_s7 + $0x180] sm:$0xff]  ;;  %1362 = vst [vmem:[%s2013_s30 + $0x558] sm:$0xff] %v677_v43 }
  0xc7   : > { %1363 = vst [vmem:[%s2013_s30 + $0x560] sm:$0xff] %v678_v44  ;;  %1364 = vst [vmem:[%s2013_s30 + $0x568] sm:$0xff] %v679_v45  ;;  %v683_v49 = vld [vmem:[%s1997_s7 + $0x188] sm:$0xff]  ;;  %v684_v50 = vld [vmem:[%s1997_s7 + $0x190] sm:$0xff] }
  0xc8   : > { %v685_v51 = vld [vmem:[%s1997_s7 + $0x198] sm:$0xff]  ;;  %1365 = vst [vmem:[%s2013_s30 + $0x570] sm:$0xff] %v680_v46  ;;  %1366 = vst [vmem:[%s2013_s30 + $0x578] sm:$0xff] %v681_v47  ;;  %v686_v52 = vld [vmem:[%s1997_s7 + $0x1a0] sm:$0xff] }
  0xc9   : > { %1367 = vst [vmem:[%s2013_s30 + $0x580] sm:$0xff] %v682_v48  ;;  %v687_v53 = vld [vmem:[%s1997_s7 + $0x1a8] sm:$0xff]  ;;  %v688_v54 = vld [vmem:[%s1997_s7 + $0x1b0] sm:$0xff]  ;;  %1368 = vst [vmem:[%s2013_s30 + $0x588] sm:$0xff] %v683_v49 }
  0xca   : > { %1369 = vst [vmem:[%s2013_s30 + $0x590] sm:$0xff] %v684_v50  ;;  %1370 = vst [vmem:[%s2013_s30 + $0x598] sm:$0xff] %v685_v51  ;;  %v689_v55 = vld [vmem:[%s1997_s7 + $0x1b8] sm:$0xff]  ;;  %v690_v56 = vld [vmem:[%s1997_s7 + $0x1c0] sm:$0xff] }
  0xcb   : > { %v691_v57 = vld [vmem:[%s1997_s7 + $0x1c8] sm:$0xff]  ;;  %1371 = vst [vmem:[%s2013_s30 + $0x5a0] sm:$0xff] %v686_v52  ;;  %1372 = vst [vmem:[%s2013_s30 + $0x5a8] sm:$0xff] %v687_v53  ;;  %v692_v58 = vld [vmem:[%s1997_s7 + $0x1d0] sm:$0xff] }
  0xcc   : > { %1373 = vst [vmem:[%s2013_s30 + $0x5b0] sm:$0xff] %v688_v54  ;;  %v693_v59 = vld [vmem:[%s1997_s7 + $0x1d8] sm:$0xff]  ;;  %v694_v60 = vld [vmem:[%s1997_s7 + $0x1e0] sm:$0xff]  ;;  %1374 = vst [vmem:[%s2013_s30 + $0x5b8] sm:$0xff] %v689_v55 }
  0xcd   : > { %1375 = vst [vmem:[%s2013_s30 + $0x5c0] sm:$0xff] %v690_v56  ;;  %1376 = vst [vmem:[%s2013_s30 + $0x5c8] sm:$0xff] %v691_v57  ;;  %v695_v61 = vld [vmem:[%s1997_s7 + $0x1e8] sm:$0xff]  ;;  %v696_v62 = vld [vmem:[%s1997_s7 + $0x1f0] sm:$0xff] }
  0xce   : > { %v697_v63 = vld [vmem:[%s1997_s7 + $0x1f8] sm:$0xff]  ;;  %1377 = vst [vmem:[%s2013_s30 + $0x5d0] sm:$0xff] %v692_v58  ;;  %1378 = vst [vmem:[%s2013_s30 + $0x5d8] sm:$0xff] %v693_v59  ;;  %v828_v0 = vld [vmem:[%s2000_s15 + $0x100] sm:$0xff] }
  0xcf   : > { %1379 = vst [vmem:[%s2013_s30 + $0x5e0] sm:$0xff] %v694_v60  ;;  %1380 = vst [vmem:[%s2013_s30 + $0x5e8] sm:$0xff] %v695_v61  ;;  %v763_v1 = vld [vmem:[%s2000_s15] sm:$0xff]  ;;  %844 = vxpose.xlu1.b32.start [1/16] %v828_v0, 128  ;;  %v829_v2 = vld [vmem:[%s2000_s15 + $0x110] sm:$0xff] }
  0xd0   : > { %1381 = vst [vmem:[%s2013_s30 + $0x5f0] sm:$0xff] %v696_v62  ;;  %1382 = vst [vmem:[%s2013_s30 + $0x5f8] sm:$0xff] %v697_v63  ;;  %779 = vxpose.xlu0.b32.start [1/16] %v763_v1, 128  ;;  %v764_v3 = vld [vmem:[%s2000_s15 + $0x10] sm:$0xff]  ;;  %v830_v4 = vld [vmem:[%s2000_s15 + $0x120] sm:$0xff] }
  0xd1   : > { %v765_v5 = vld [vmem:[%s2000_s15 + $0x20] sm:$0xff]  ;;  %v831_v6 = vld [vmem:[%s2000_s15 + $0x130] sm:$0xff]  ;;  %v956_v32 = vld [vmem:[%s2000_s15 + $0x108] sm:$0xff] }
  0xd2   : > { %v766_v7 = vld [vmem:[%s2000_s15 + $0x30] sm:$0xff]  ;;  %v832_v8 = vld [vmem:[%s2000_s15 + $0x140] sm:$0xff]  ;;  %v892_v33 = vld [vmem:[%s2000_s15 + $0x8] sm:$0xff] }
  0xd3   : > { %845 = vxpose.xlu1.b32.cont [2/16] %v829_v2, 128  ;;  %v767_v9 = vld [vmem:[%s2000_s15 + $0x40] sm:$0xff]  ;;  %v833_v10 = vld [vmem:[%s2000_s15 + $0x150] sm:$0xff]  ;;  %v957_v34 = vld [vmem:[%s2000_s15 + $0x118] sm:$0xff] }
  0xd4   : > { %780 = vxpose.xlu0.b32.cont [2/16] %v764_v3, 128  ;;  %v768_v11 = vld [vmem:[%s2000_s15 + $0x50] sm:$0xff]  ;;  %v834_v12 = vld [vmem:[%s2000_s15 + $0x160] sm:$0xff]  ;;  %v893_v35 = vld [vmem:[%s2000_s15 + $0x18] sm:$0xff] }
  0xd5   : > { %v769_v13 = vld [vmem:[%s2000_s15 + $0x60] sm:$0xff]  ;;  %v835_v14 = vld [vmem:[%s2000_s15 + $0x170] sm:$0xff]  ;;  %v958_v36 = vld [vmem:[%s2000_s15 + $0x128] sm:$0xff] }
  0xd6   : > { %v770_v15 = vld [vmem:[%s2000_s15 + $0x70] sm:$0xff]  ;;  %v836_v16 = vld [vmem:[%s2000_s15 + $0x180] sm:$0xff]  ;;  %v894_v37 = vld [vmem:[%s2000_s15 + $0x28] sm:$0xff] }
  0xd7   : > { %846 = vxpose.xlu1.b32.cont [3/16] %v830_v4, 128  ;;  %v771_v17 = vld [vmem:[%s2000_s15 + $0x80] sm:$0xff]  ;;  %v837_v18 = vld [vmem:[%s2000_s15 + $0x190] sm:$0xff]  ;;  %v959_v38 = vld [vmem:[%s2000_s15 + $0x138] sm:$0xff] }
  0xd8   : > { %781 = vxpose.xlu0.b32.cont [3/16] %v765_v5, 128  ;;  %v772_v19 = vld [vmem:[%s2000_s15 + $0x90] sm:$0xff]  ;;  %v838_v20 = vld [vmem:[%s2000_s15 + $0x1a0] sm:$0xff]  ;;  %v895_v39 = vld [vmem:[%s2000_s15 + $0x38] sm:$0xff] }
  0xd9   : > { %v773_v21 = vld [vmem:[%s2000_s15 + $0xa0] sm:$0xff]  ;;  %v839_v22 = vld [vmem:[%s2000_s15 + $0x1b0] sm:$0xff]  ;;  %v960_v40 = vld [vmem:[%s2000_s15 + $0x148] sm:$0xff] }
  0xda   : > { %v774_v23 = vld [vmem:[%s2000_s15 + $0xb0] sm:$0xff]  ;;  %v840_v24 = vld [vmem:[%s2000_s15 + $0x1c0] sm:$0xff]  ;;  %v896_v41 = vld [vmem:[%s2000_s15 + $0x48] sm:$0xff] }
  0xdb   : > { %847 = vxpose.xlu1.b32.cont [4/16] %v831_v6, 128  ;;  %v775_v25 = vld [vmem:[%s2000_s15 + $0xc0] sm:$0xff]  ;;  %v841_v26 = vld [vmem:[%s2000_s15 + $0x1d0] sm:$0xff]  ;;  %v961_v42 = vld [vmem:[%s2000_s15 + $0x158] sm:$0xff] }
  0xdc   : > { %782 = vxpose.xlu0.b32.cont [4/16] %v766_v7, 128  ;;  %v776_v27 = vld [vmem:[%s2000_s15 + $0xd0] sm:$0xff]  ;;  %v842_v28 = vld [vmem:[%s2000_s15 + $0x1e0] sm:$0xff]  ;;  %v897_v43 = vld [vmem:[%s2000_s15 + $0x58] sm:$0xff] }
  0xdd   : > { %v777_v29 = vld [vmem:[%s2000_s15 + $0xe0] sm:$0xff]  ;;  %v843_v30 = vld [vmem:[%s2000_s15 + $0x1f0] sm:$0xff]  ;;  %v962_v44 = vld [vmem:[%s2000_s15 + $0x168] sm:$0xff] }
  0xde   : > { %v778_v31 = vld [vmem:[%s2000_s15 + $0xf0] sm:$0xff]  ;;  %v898_v45 = vld [vmem:[%s2000_s15 + $0x68] sm:$0xff]  ;;  %v963_v46 = vld [vmem:[%s2000_s15 + $0x178] sm:$0xff] }
  0xdf   : > { %848 = vxpose.xlu1.b32.cont [5/16] %v832_v8, 128  ;;  %v899_v47 = vld [vmem:[%s2000_s15 + $0x78] sm:$0xff]  ;;  %v964_v48 = vld [vmem:[%s2000_s15 + $0x188] sm:$0xff] }
  0xe0   : > { %783 = vxpose.xlu0.b32.cont [5/16] %v767_v9, 128  ;;  %v900_v49 = vld [vmem:[%s2000_s15 + $0x88] sm:$0xff]  ;;  %v965_v50 = vld [vmem:[%s2000_s15 + $0x198] sm:$0xff] }
  0xe1   : > { %v901_v51 = vld [vmem:[%s2000_s15 + $0x98] sm:$0xff]  ;;  %v966_v52 = vld [vmem:[%s2000_s15 + $0x1a8] sm:$0xff] }
  0xe2   : > { %v902_v53 = vld [vmem:[%s2000_s15 + $0xa8] sm:$0xff]  ;;  %v967_v54 = vld [vmem:[%s2000_s15 + $0x1b8] sm:$0xff] }
  0xe3   : > { %849 = vxpose.xlu1.b32.cont [6/16] %v833_v10, 128  ;;  %v903_v55 = vld [vmem:[%s2000_s15 + $0xb8] sm:$0xff]  ;;  %v968_v56 = vld [vmem:[%s2000_s15 + $0x1c8] sm:$0xff] }
  0xe4   : > { %784 = vxpose.xlu0.b32.cont [6/16] %v768_v11, 128  ;;  %v904_v57 = vld [vmem:[%s2000_s15 + $0xc8] sm:$0xff]  ;;  %v969_v58 = vld [vmem:[%s2000_s15 + $0x1d8] sm:$0xff] }
  0xe5   : > { %v905_v59 = vld [vmem:[%s2000_s15 + $0xd8] sm:$0xff]  ;;  %v970_v60 = vld [vmem:[%s2000_s15 + $0x1e8] sm:$0xff] }
  0xe6   : > { %v906_v61 = vld [vmem:[%s2000_s15 + $0xe8] sm:$0xff]  ;;  %v971_v62 = vld [vmem:[%s2000_s15 + $0x1f8] sm:$0xff] }
  0xe7   : > { %850 = vxpose.xlu1.b32.cont [7/16] %v834_v12, 128  ;;  %v907_v63 = vld [vmem:[%s2000_s15 + $0xf8] sm:$0xff] }
  0xe8   : > { %785 = vxpose.xlu0.b32.cont [7/16] %v769_v13, 128 }
  0xeb   : > { %851 = vxpose.xlu1.b32.cont [8/16] %v835_v14, 128 }
  0xec   : > { %786 = vxpose.xlu0.b32.cont [8/16] %v770_v15, 128 }
  0xef   : > { %852 = vxpose.xlu1.b32.cont [9/16] %v836_v16, 128 }
  0xf0   : > { %787 = vxpose.xlu0.b32.cont [9/16] %v771_v17, 128 }
  0xf3   : > { %853 = vxpose.xlu1.b32.cont [10/16] %v837_v18, 128 }
  0xf4   : > { %788 = vxpose.xlu0.b32.cont [10/16] %v772_v19, 128 }
  0xf7   : > { %854 = vxpose.xlu1.b32.cont [11/16] %v838_v20, 128 }
  0xf8   : > { %789 = vxpose.xlu0.b32.cont [11/16] %v773_v21, 128 }
  0xfb   : > { %855 = vxpose.xlu1.b32.cont [12/16] %v839_v22, 128 }
  0xfc   : > { %790 = vxpose.xlu0.b32.cont [12/16] %v774_v23, 128 }
  0xff   : > { %856 = vxpose.xlu1.b32.cont [13/16] %v840_v24, 128 }
 0x100   : > { %791 = vxpose.xlu0.b32.cont [13/16] %v775_v25, 128 }
 0x103   : > { %857 = vxpose.xlu1.b32.cont [14/16] %v841_v26, 128 }
 0x104   : > { %792 = vxpose.xlu0.b32.cont [14/16] %v776_v27, 128 }
 0x107   : > { %858 = vxpose.xlu1.b32.cont [15/16] %v842_v28, 128 }
 0x108   : > { %793 = vxpose.xlu0.b32.cont [15/16] %v777_v29, 128 }
 0x10b   : > { %859 = vxpose.xlu1.b32.end [16/16] %v843_v30, 128 }
 0x10c   : > { %794 = vxpose.xlu0.b32.end [16/16] %v778_v31, 128 }
 0x10f   : > { %972 = vxpose.xlu1.b32.start [1/16] %v956_v32, 128 }
 0x110   : > { %908 = vxpose.xlu0.b32.start [1/16] %v892_v33, 128 }
 0x113   : > { %973 = vxpose.xlu1.b32.cont [2/16] %v957_v34, 128 }
 0x114   : > { %909 = vxpose.xlu0.b32.cont [2/16] %v893_v35, 128 }
 0x117   : > { %974 = vxpose.xlu1.b32.cont [3/16] %v958_v36, 128 }
 0x118   : > { %910 = vxpose.xlu0.b32.cont [3/16] %v894_v37, 128 }
 0x11b   : > { %975 = vxpose.xlu1.b32.cont [4/16] %v959_v38, 128 }
 0x11c   : > { %911 = vxpose.xlu0.b32.cont [4/16] %v895_v39, 128 }
 0x11f   : > { %976 = vxpose.xlu1.b32.cont [5/16] %v960_v40, 128 }
 0x120   : > { %912 = vxpose.xlu0.b32.cont [5/16] %v896_v41, 128 }
 0x123   : > { %977 = vxpose.xlu1.b32.cont [6/16] %v961_v42, 128 }
 0x124   : > { %913 = vxpose.xlu0.b32.cont [6/16] %v897_v43, 128 }
 0x127   : > { %978 = vxpose.xlu1.b32.cont [7/16] %v962_v44, 128 }
 0x128   : > { %914 = vxpose.xlu0.b32.cont [7/16] %v898_v45, 128 }
 0x12b   : > { %979 = vxpose.xlu1.b32.cont [8/16] %v963_v46, 128 }
 0x12c   : > { %915 = vxpose.xlu0.b32.cont [8/16] %v899_v47, 128 }
 0x12f   : > { %980 = vxpose.xlu1.b32.cont [9/16] %v964_v48, 128 }
 0x130   : > { %916 = vxpose.xlu0.b32.cont [9/16] %v900_v49, 128 }
 0x133   : > { %981 = vxpose.xlu1.b32.cont [10/16] %v965_v50, 128 }
 0x134   : > { %917 = vxpose.xlu0.b32.cont [10/16] %v901_v51, 128 }
 0x137   : > { %982 = vxpose.xlu1.b32.cont [11/16] %v966_v52, 128 }
 0x138   : > { %918 = vxpose.xlu0.b32.cont [11/16] %v902_v53, 128 }
 0x13b   : > { %983 = vxpose.xlu1.b32.cont [12/16] %v967_v54, 128 }
 0x13c   : > { %919 = vxpose.xlu0.b32.cont [12/16] %v903_v55, 128 }
 0x13f   : > { %984 = vxpose.xlu1.b32.cont [13/16] %v968_v56, 128 }
 0x140   : > { %920 = vxpose.xlu0.b32.cont [13/16] %v904_v57, 128 }
 0x143   : > { %985 = vxpose.xlu1.b32.cont [14/16] %v969_v58, 128 }
 0x144   : > { %921 = vxpose.xlu0.b32.cont [14/16] %v905_v59, 128 }
 0x147   : > { %986 = vxpose.xlu1.b32.cont [15/16] %v970_v60, 128 }
 0x148   : > { %922 = vxpose.xlu0.b32.cont [15/16] %v906_v61, 128 }
 0x14b   : > { %987 = vxpose.xlu1.b32.end [16/16] %v971_v62, 128  ;;  %v860_v0 = vpop.trf.xlu1 }
 0x14c   : > { %923 = vxpose.xlu0.b32.end [16/16] %v907_v63, 128  ;;  %v795_v1 = vpop.trf.xlu0  ;;  %1399 = vst [vmem:[%s2013_s30 + $0x608] sm:$0xff] %v860_v0 }
 0x14d   : > { %1383 = vst [vmem:[%s2013_s30 + $0x600] sm:$0xff] %v795_v1 }
 0x14f   : > { %v861_v2 = vpop.trf.xlu1 }
 0x150   : > { %v796_v3 = vpop.trf.xlu0  ;;  %1400 = vst [vmem:[%s2013_s30 + $0x618] sm:$0xff] %v861_v2 }
 0x151   : > { %1384 = vst [vmem:[%s2013_s30 + $0x610] sm:$0xff] %v796_v3 }
 0x153   : > { %v862_v4 = vpop.trf.xlu1 }
 0x154   : > { %v797_v5 = vpop.trf.xlu0  ;;  %1401 = vst [vmem:[%s2013_s30 + $0x628] sm:$0xff] %v862_v4 }
 0x155   : > { %1385 = vst [vmem:[%s2013_s30 + $0x620] sm:$0xff] %v797_v5 }
 0x157   : > { %v863_v6 = vpop.trf.xlu1 }
 0x158   : > { %v798_v7 = vpop.trf.xlu0  ;;  %1402 = vst [vmem:[%s2013_s30 + $0x638] sm:$0xff] %v863_v6 }
 0x159   : > { %1386 = vst [vmem:[%s2013_s30 + $0x630] sm:$0xff] %v798_v7 }
 0x15b   : > { %v864_v8 = vpop.trf.xlu1 }
 0x15c   : > { %v799_v9 = vpop.trf.xlu0  ;;  %1403 = vst [vmem:[%s2013_s30 + $0x648] sm:$0xff] %v864_v8 }
 0x15d   : > { %1387 = vst [vmem:[%s2013_s30 + $0x640] sm:$0xff] %v799_v9 }
 0x15f   : > { %v865_v10 = vpop.trf.xlu1 }
 0x160   : > { %v800_v11 = vpop.trf.xlu0  ;;  %1404 = vst [vmem:[%s2013_s30 + $0x658] sm:$0xff] %v865_v10 }
 0x161   : > { %1388 = vst [vmem:[%s2013_s30 + $0x650] sm:$0xff] %v800_v11 }
 0x163   : > { %v866_v12 = vpop.trf.xlu1 }
 0x164   : > { %v801_v13 = vpop.trf.xlu0  ;;  %1405 = vst [vmem:[%s2013_s30 + $0x668] sm:$0xff] %v866_v12 }
 0x165   : > { %1389 = vst [vmem:[%s2013_s30 + $0x660] sm:$0xff] %v801_v13 }
 0x167   : > { %v867_v14 = vpop.trf.xlu1 }
 0x168   : > { %v802_v15 = vpop.trf.xlu0  ;;  %1406 = vst [vmem:[%s2013_s30 + $0x678] sm:$0xff] %v867_v14 }
 0x169   : > { %1390 = vst [vmem:[%s2013_s30 + $0x670] sm:$0xff] %v802_v15 }
 0x16b   : > { %v868_v16 = vpop.trf.xlu1 }
 0x16c   : > { %v803_v17 = vpop.trf.xlu0  ;;  %1407 = vst [vmem:[%s2013_s30 + $0x688] sm:$0xff] %v868_v16 }
 0x16d   : > { %1391 = vst [vmem:[%s2013_s30 + $0x680] sm:$0xff] %v803_v17 }
 0x16f   : > { %v869_v18 = vpop.trf.xlu1 }
 0x170   : > { %v804_v19 = vpop.trf.xlu0  ;;  %1408 = vst [vmem:[%s2013_s30 + $0x698] sm:$0xff] %v869_v18 }
 0x171   : > { %1392 = vst [vmem:[%s2013_s30 + $0x690] sm:$0xff] %v804_v19 }
 0x173   : > { %v870_v20 = vpop.trf.xlu1 }
 0x174   : > { %v805_v21 = vpop.trf.xlu0  ;;  %1409 = vst [vmem:[%s2013_s30 + $0x6a8] sm:$0xff] %v870_v20 }
 0x175   : > { %1393 = vst [vmem:[%s2013_s30 + $0x6a0] sm:$0xff] %v805_v21 }
 0x177   : > { %v871_v22 = vpop.trf.xlu1 }
 0x178   : > { %v806_v23 = vpop.trf.xlu0  ;;  %1410 = vst [vmem:[%s2013_s30 + $0x6b8] sm:$0xff] %v871_v22 }
 0x179   : > { %1394 = vst [vmem:[%s2013_s30 + $0x6b0] sm:$0xff] %v806_v23 }
 0x17b   : > { %v872_v24 = vpop.trf.xlu1 }
 0x17c   : > { %v807_v25 = vpop.trf.xlu0  ;;  %1411 = vst [vmem:[%s2013_s30 + $0x6c8] sm:$0xff] %v872_v24 }
 0x17d   : > { %1395 = vst [vmem:[%s2013_s30 + $0x6c0] sm:$0xff] %v807_v25 }
 0x17f   : > { %v873_v26 = vpop.trf.xlu1 }
 0x180   : > { %v808_v27 = vpop.trf.xlu0  ;;  %1412 = vst [vmem:[%s2013_s30 + $0x6d8] sm:$0xff] %v873_v26 }
 0x181   : > { %1396 = vst [vmem:[%s2013_s30 + $0x6d0] sm:$0xff] %v808_v27 }
 0x183   : > { %v874_v28 = vpop.trf.xlu1 }
 0x184   : > { %v809_v29 = vpop.trf.xlu0  ;;  %1413 = vst [vmem:[%s2013_s30 + $0x6e8] sm:$0xff] %v874_v28 }
 0x185   : > { %1397 = vst [vmem:[%s2013_s30 + $0x6e0] sm:$0xff] %v809_v29 }
 0x187   : > { %v875_v30 = vpop.trf.xlu1 }
 0x188   : > { %v810_v31 = vpop.trf.xlu0  ;;  %1414 = vst [vmem:[%s2013_s30 + $0x6f8] sm:$0xff] %v875_v30 }
 0x189   : > { %1398 = vst [vmem:[%s2013_s30 + $0x6f0] sm:$0xff] %v810_v31 }
 0x18b   : > { %v988_v32 = vpop.trf.xlu1 }
 0x18c   : > { %v924_v33 = vpop.trf.xlu0  ;;  %1431 = vst [vmem:[%s2013_s30 + $0x708] sm:$0xff] %v988_v32 }
 0x18d   : > { %1415 = vst [vmem:[%s2013_s30 + $0x700] sm:$0xff] %v924_v33 }
 0x18f   : > { %v989_v34 = vpop.trf.xlu1 }
 0x190   : > { %v925_v35 = vpop.trf.xlu0  ;;  %1432 = vst [vmem:[%s2013_s30 + $0x718] sm:$0xff] %v989_v34 }
 0x191   : > { %1416 = vst [vmem:[%s2013_s30 + $0x710] sm:$0xff] %v925_v35 }
 0x193   : > { %v990_v36 = vpop.trf.xlu1 }
 0x194   : > { %v926_v37 = vpop.trf.xlu0  ;;  %1433 = vst [vmem:[%s2013_s30 + $0x728] sm:$0xff] %v990_v36 }
 0x195   : > { %1417 = vst [vmem:[%s2013_s30 + $0x720] sm:$0xff] %v926_v37 }
 0x197   : > { %v991_v38 = vpop.trf.xlu1 }
 0x198   : > { %v927_v39 = vpop.trf.xlu0  ;;  %1434 = vst [vmem:[%s2013_s30 + $0x738] sm:$0xff] %v991_v38 }
 0x199   : > { %1418 = vst [vmem:[%s2013_s30 + $0x730] sm:$0xff] %v927_v39 }
 0x19b   : > { %v992_v40 = vpop.trf.xlu1 }
 0x19c   : > { %v928_v41 = vpop.trf.xlu0  ;;  %1435 = vst [vmem:[%s2013_s30 + $0x748] sm:$0xff] %v992_v40 }
 0x19d   : > { %1419 = vst [vmem:[%s2013_s30 + $0x740] sm:$0xff] %v928_v41 }
 0x19f   : > { %v993_v42 = vpop.trf.xlu1 }
 0x1a0   : > { %v929_v43 = vpop.trf.xlu0  ;;  %1436 = vst [vmem:[%s2013_s30 + $0x758] sm:$0xff] %v993_v42 }
 0x1a1   : > { %1420 = vst [vmem:[%s2013_s30 + $0x750] sm:$0xff] %v929_v43 }
 0x1a3   : > { %v994_v44 = vpop.trf.xlu1 }
 0x1a4   : > { %v930_v45 = vpop.trf.xlu0  ;;  %1437 = vst [vmem:[%s2013_s30 + $0x768] sm:$0xff] %v994_v44 }
 0x1a5   : > { %1421 = vst [vmem:[%s2013_s30 + $0x760] sm:$0xff] %v930_v45 }
 0x1a7   : > { %v995_v46 = vpop.trf.xlu1 }
 0x1a8   : > { %v931_v47 = vpop.trf.xlu0  ;;  %1438 = vst [vmem:[%s2013_s30 + $0x778] sm:$0xff] %v995_v46 }
 0x1a9   : > { %1422 = vst [vmem:[%s2013_s30 + $0x770] sm:$0xff] %v931_v47 }
 0x1ab   : > { %v996_v48 = vpop.trf.xlu1 }
 0x1ac   : > { %v932_v49 = vpop.trf.xlu0  ;;  %1439 = vst [vmem:[%s2013_s30 + $0x788] sm:$0xff] %v996_v48 }
 0x1ad   : > { %1423 = vst [vmem:[%s2013_s30 + $0x780] sm:$0xff] %v932_v49 }
 0x1af   : > { %v997_v50 = vpop.trf.xlu1 }
 0x1b0   : > { %v933_v51 = vpop.trf.xlu0  ;;  %1440 = vst [vmem:[%s2013_s30 + $0x798] sm:$0xff] %v997_v50 }
 0x1b1   : > { %1424 = vst [vmem:[%s2013_s30 + $0x790] sm:$0xff] %v933_v51 }
 0x1b3   : > { %v998_v52 = vpop.trf.xlu1 }
 0x1b4   : > { %v934_v53 = vpop.trf.xlu0  ;;  %1441 = vst [vmem:[%s2013_s30 + $0x7a8] sm:$0xff] %v998_v52 }
 0x1b5   : > { %1425 = vst [vmem:[%s2013_s30 + $0x7a0] sm:$0xff] %v934_v53 }
 0x1b7   : > { %v999_v54 = vpop.trf.xlu1 }
 0x1b8   : > { %v935_v55 = vpop.trf.xlu0  ;;  %1442 = vst [vmem:[%s2013_s30 + $0x7b8] sm:$0xff] %v999_v54 }
 0x1b9   : > { %1426 = vst [vmem:[%s2013_s30 + $0x7b0] sm:$0xff] %v935_v55 }
 0x1bb   : > { %v1000_v56 = vpop.trf.xlu1 }
 0x1bc   : > { %v936_v57 = vpop.trf.xlu0  ;;  %1443 = vst [vmem:[%s2013_s30 + $0x7c8] sm:$0xff] %v1000_v56 }
 0x1bd   : > { %1427 = vst [vmem:[%s2013_s30 + $0x7c0] sm:$0xff] %v936_v57 }
 0x1bf   : > { %v1001_v58 = vpop.trf.xlu1 }
 0x1c0   : > { %v937_v59 = vpop.trf.xlu0  ;;  %1444 = vst [vmem:[%s2013_s30 + $0x7d8] sm:$0xff] %v1001_v58 }
 0x1c1   : > { %1428 = vst [vmem:[%s2013_s30 + $0x7d0] sm:$0xff] %v937_v59 }
 0x1c3   : > { %v1002_v60 = vpop.trf.xlu1 }
 0x1c4   : > { %v938_v61 = vpop.trf.xlu0  ;;  %1445 = vst [vmem:[%s2013_s30 + $0x7e8] sm:$0xff] %v1002_v60 }
 0x1c5   : > { %1429 = vst [vmem:[%s2013_s30 + $0x7e0] sm:$0xff] %v938_v61 }
 0x1c7   : > { %v1003_v62 = vpop.trf.xlu1 }
 0x1c8   : > { %v939_v63 = vpop.trf.xlu0  ;;  %1446 = vst [vmem:[%s2013_s30 + $0x7f8] sm:$0xff] %v1003_v62 }
 0x1c9   : > { %1430 = vst [vmem:[%s2013_s30 + $0x7f0] sm:$0xff] %v939_v63 }
 0x1ca   : > { %s2604_s10 = sld [smem:[#allocation19_spill]]  ;;  %s1449_s12 = sshll.u32 %s1743_s18, 1 }
 0x1cb   : > { %s1047_s24 = sshll.u32 %s2013_s30, 4  ;;  %s2606_s4 = sld [smem:[#allocation27_spill]]  ;;  %s1048_s24 = int_to_ptr.vmem [resolvable:$true] %s1047_s24 }
 0x1cc   : > { %s1768_s9 = smov 8192   ;;  %s1769_s11 = smov 32768  }
 0x1cd   : > { %1467 = sst [smem:[#allocation12]] (%p1870_p9), %s1768_s9  ;;  %s1770_s27 = smov 32  }
 0x1ce   : > { %1468 = sst [smem:[#allocation12 + $0x1]] (%p1870_p9), %s1769_s11  ;;  %s1771_s18 = smov 256  }
 0x1cf   : > { %1469 = sst [smem:[#allocation12 + $0x2]] (%p1870_p9), %s1770_s27  ;;  %s1772_s13 = smov 512  }
 0x1d0   : > { %s1458_s19 = sshll.u32 %s2604_s10, 7  ;;  %1470 = sst [smem:[#allocation12 + $0x3]] (%p1870_p9), %s1771_s18 }
 0x1d1   : > { %s1034_s25 = sadd.s32 %s1458_s19, %s1449_s12  ;;  %1471 = sst [smem:[#allocation12 + $0x4]] (%p1870_p9), %s1772_s13 }
 0x1d2   : > { %s1451_s1 = sshll.u32 %s1034_s25, 7  ;;  %s1773_s0 = smov 16  }
 0x1d3   : > { %s1036_s29 = scalar_lea.hbm %s2606_s4, %s1451_s1  ;;  %1472 = sst [smem:[#allocation12 + $0x5]] (%p1870_p9), %s1773_s0 }
 0x1d4   : > { %s1774_s14 = smov 131072   ;;  %s1775_s6 = smov 0  }
 0x1d5   : > { %1473 = dma.general (%p1870_p9), %s1048_s24, 32768, %s1036_s29, %s1021_s26, %s1774_s14, [#allocation12], %s1775_s6, 0  }
 0x1d6 PF: > { %s2607_s7 = sld [smem:[#allocation17_spill]]  ;;  %p1493_p8 = scmp.ge.s32.totalorder %s1759_s22, 2 }
 0x1d8   : > { %p1489_p0 = pnand %p1493_p8, %p1876_p12 }
 0x1da   : > { %p1490_p3 = pneg %p1489_p0 }
 0x1dc   : > { %s1075_s15 = sand.u32 1, %s2607_s7  }
 0x1dd   : > { %s1076_s23 = scalar_lea.sflag [#allocation4], %s1075_s15 }
 0x1de   : > { %1726 = dma.done.wait (%p1490_p3), %s1076_s23, 32768  }
 0x1df   : > { %1728 = vsyncadd (%p1490_p3), %s1076_s23, 4294934528  ;;  %s26_s22 = sadd.s32 1, %s1759_s22   ;;  %s2609_s30 = sld [smem:[#allocation18_spill]] }
 0x1e0   : > { %p23_p4 = scmp.ge.s32.totalorder %s26_s22, 6   ;;  %s2610_s17 = sld [smem:[#allocation24_spill]] }
 0x1e1   : > { %s2611_s26 = sld [smem:[#allocation20_spill]]  ;;  %s2613_s15 = smov %s1735_s16 }
 0x1e2   : > { %s2612_s10 = sld [smem:[#allocation21_spill]]  ;;  %s2615_s18 = smov %s1751_s20 }
 0x1e3   : > { %s2616_s19 = smov %s1755_s21 }
 0x1e4   :  { %25 = sbr.rel (!%p23_p4) target bundleno = 15 (0xf), region = 126 }
 0x1e5   : > { %s2614_s16 = smov %s2609_s30 }
 0x1e7   : > { %s2617_s20 = smov %s2611_s26 }
 0x1e8   : > { %s2618_s21 = smov %s2612_s10 }
 0x1e9   :  { %1081 = vsyncpa [#allocation3], 1 }
 0x1ea   :  { %1083 = vsyncpa [#allocation3 + $0x1], 1 }
 0x1eb   :  { %1084 = vsyncpa [#allocation6], 1 }
 0x1ec   :  { %1086 = vsyncpa [#allocation6 + $0x1], 1 }
 0x1ed   :  { %1087 = vsyncpa [#allocation9], 1 }
 0x1ee   :  { %1089 = vsyncpa [#allocation9 + $0x1], 1 }
 0x1ef   :  { %1090 = vsyncpa [#allocation4], 1 }
 0x1f0   :  { %1092 = vsyncpa [#allocation4 + $0x1], 1 }

</bundles_post_ra>
